<compile_context>
chip_gen: v7x
topology: tpu7x:2x2x1
jax: 0.10.0
libtpu: 0.0.40
codegen_flags: <defaults>
</compile_context>

<pallas_src>
import math
import functools

import jax
import jax.numpy as jnp
from jax.experimental import pallas as pl
from jax.experimental.pallas import tpu as pltpu


def _cross_attn_kernel(text_ref, audio_ref,
                       wq_ref, bq_ref, wkv_ref, bkv_ref,
                       wo_ref, bo_ref,
                       ln1w_ref, ln1b_ref,
                       w1_ref, b1_ref, w2_ref, b2_ref,
                       ln2w_ref, ln2b_ref,
                       out_ref,
                       *, n_heads: int, head_dim: int, eps: float,
                       approx_recip: bool):
    Bt, Tq, H = text_ref.shape
    Lk = audio_ref.shape[1]
    md = wq_ref.dtype                        # matmul operand dtype (bf16 prod / f32 test)
    inv_scale = 1.0 / math.sqrt(float(head_dim))

    # Fold the batch tile into the row (sublane/M) dimension for all dense math.
    t = text_ref[...].reshape(Bt * Tq, H)    # f32 residual stream
    a = audio_ref[...].reshape(Bt * Lk, H)

    # --- projections: Q from text, fused K|V from audio (one wide matmul) ---
    q = jnp.dot(t.astype(md), wq_ref[...],
                preferred_element_type=jnp.float32) + bq_ref[...]
    q = q * inv_scale                        # fold 1/sqrt(head_dim) into Q once
    kv = jnp.dot(a.astype(md), wkv_ref[...],
                 preferred_element_type=jnp.float32) + bkv_ref[...]
    k = kv[:, :H]
    v = kv[:, H:]

    # --- multi-head attention as one batched contraction over (Bt * n_heads) ---
    # TODO(synk): at production scale pad head_dim to 128 so the head split/merge is a
    # free lane-tile view instead of an XLU relayout.
    G = Bt * n_heads
    qh = jnp.transpose(q.reshape(Bt, Tq, n_heads, head_dim),
                       (0, 2, 1, 3)).reshape(G, Tq, head_dim)
    kh = jnp.transpose(k.reshape(Bt, Lk, n_heads, head_dim),
                       (0, 2, 1, 3)).reshape(G, Lk, head_dim)
    vh = jnp.transpose(v.reshape(Bt, Lk, n_heads, head_dim),
                       (0, 2, 1, 3)).reshape(G, Lk, head_dim)

    # scores: contract the last dim of both operands (no materialized K^T)
    s = jnp.einsum('gqd,gkd->gqk', qh.astype(md), kh.astype(md),
                   preferred_element_type=jnp.float32)
    s = s - jnp.max(s, axis=-1, keepdims=True)
    p = jnp.exp(s)
    # approx=True routes the divide to the EUP (free slot); exact for the f32 test path.
    alpha = p * pl.reciprocal(jnp.sum(p, axis=-1, keepdims=True),
                              approx=approx_recip)

    ctx = jnp.einsum('gqk,gkd->gqd', alpha.astype(md), vh.astype(md),
                     preferred_element_type=jnp.float32)
    attn = jnp.transpose(ctx.reshape(Bt, n_heads, Tq, head_dim),
                         (0, 2, 1, 3)).reshape(Bt * Tq, H)

    # --- output projection ---
    attn = jnp.dot(attn.astype(md), wo_ref[...],
                   preferred_element_type=jnp.float32) + bo_ref[...]

    # --- residual + LayerNorm 1 (f32) ---
    x = t + attn                             # dropout == identity (eval)
    mu = jnp.mean(x, axis=-1, keepdims=True)
    var = jnp.mean((x - mu) ** 2, axis=-1, keepdims=True)
    x = (x - mu) * jax.lax.rsqrt(var + eps) * ln1w_ref[...] + ln1b_ref[...]

    # --- position-wise feed-forward ---
    h1 = jnp.dot(x.astype(md), w1_ref[...],
                 preferred_element_type=jnp.float32) + b1_ref[...]
    h1 = jnp.maximum(h1, 0.0)                # relu (dropout == identity)
    ff = jnp.dot(h1.astype(md), w2_ref[...],
                 preferred_element_type=jnp.float32) + b2_ref[...]

    # --- residual + LayerNorm 2 (f32) ---
    y = x + ff
    mu2 = jnp.mean(y, axis=-1, keepdims=True)
    var2 = jnp.mean((y - mu2) ** 2, axis=-1, keepdims=True)
    y = (y - mu2) * jax.lax.rsqrt(var2 + eps) * ln2w_ref[...] + ln2b_ref[...]

    out_ref[...] = y.reshape(Bt, Tq, H).astype(out_ref.dtype)


def _pick_batch_tile(B, rows_per_b, target_rows=512):
    """Largest divisor Bt of B with Bt*rows <= target_rows and >= 2 grid steps when B >= 2."""
    cap = max(1, B // 2)                     # keep >= 2 parallel steps for 2-TC chips
    bt = 1
    for cand in range(1, B + 1):
        if B % cand == 0 and cand <= cap and cand * rows_per_b <= target_rows:
            bt = cand
    return bt


def _pick_q_tile(Lq, target=256):
    """Tile Lq only when long; tiles must be multiples of 8 (f32 sublane) or the full dim."""
    if Lq <= target:
        return Lq
    best = Lq
    for d in range(8, target + 1, 8):
        if Lq % d == 0:
            best = d
    return best


def _pick_vmem_limit():
    """Generation-aware VMEM budget (v7x: 64 MiB physical; v5e/v6e: 128 MiB)."""
    try:
        cap = pltpu.get_tpu_info().vmem_capacity_bytes
        return min(int(cap * 0.7), 100 * 1024 * 1024)
    except Exception:
        return 64 * 1024 * 1024


def cross_attention_layer(text, audio, params, *, n_heads,
                          matmul_dtype=jnp.bfloat16):
    """text: (B, Lq, H), audio: (B, Lk, H) -> (B, Lq, H)."""
    B, Lq, H = text.shape
    _, Lk, _ = audio.shape
    pf = params["w1"].shape[1]
    head_dim = H // n_heads

    Tq = _pick_q_tile(Lq)
    nq = Lq // Tq
    Bt = _pick_batch_tile(B, max(Tq, Lk))
    nb = B // Bt

    md = matmul_dtype
    wq = params["wq"].astype(md)
    wkv = jnp.concatenate([params["wk"], params["wv"]], axis=1).astype(md)
    bkv = jnp.concatenate([params["bk"], params["bv"]], axis=1)
    wo = params["wo"].astype(md)
    w1 = params["w1"].astype(md)
    w2 = params["w2"].astype(md)

    def weight_spec(shape):
        # Constant block index across the whole grid -> fetched once per core; and
        # single-buffered so no second pipeline buffer is allocated for it.
        return pl.BlockSpec(shape, lambda b, q: (0,) * len(shape),
                            pipeline_mode=pl.Buffered(1))

    kernel = functools.partial(
        _cross_attn_kernel,
        n_heads=n_heads, head_dim=head_dim, eps=1e-5,
        approx_recip=(md == jnp.bfloat16))

    return pl.pallas_call(
        kernel,
        out_shape=jax.ShapeDtypeStruct((B, Lq, H), text.dtype),
        grid_spec=pltpu.PrefetchScalarGridSpec(
            num_scalar_prefetch=0,
            grid=(nb, nq),
            in_specs=[
                pl.BlockSpec((Bt, Tq, H), lambda b, q: (b, q, 0)),   # text (query tile)
                pl.BlockSpec((Bt, Lk, H), lambda b, q: (b, 0, 0)),   # audio (constant in q)
                weight_spec((H, H)), weight_spec((1, H)),            # Wq, bq
                weight_spec((H, 2 * H)), weight_spec((1, 2 * H)),    # [Wk|Wv], [bk|bv]
                weight_spec((H, H)), weight_spec((1, H)),            # Wo, bo
                weight_spec((1, H)), weight_spec((1, H)),            # ln1 w, b
                weight_spec((H, pf)), weight_spec((1, pf)),          # fc1 W, b
                weight_spec((pf, H)), weight_spec((1, H)),           # fc2 W, b
                weight_spec((1, H)), weight_spec((1, H)),            # ln2 w, b
            ],
            out_specs=pl.BlockSpec((Bt, Tq, H), lambda b, q: (b, q, 0)),
        ),
        compiler_params=pltpu.CompilerParams(
            dimension_semantics=("parallel", "parallel"),
            vmem_limit_bytes=_pick_vmem_limit(),
        ),
    )(text, audio,
      wq, params["bq"], wkv, bkv, wo, params["bo"],
      params["ln1_w"], params["ln1_b"],
      w1, params["b1"], w2, params["b2"],
      params["ln2_w"], params["ln2_b"])


def _init_params(key, H, pf):
    """Deterministic init mimicking PyTorch nn.Linear defaults (uniform +-1/sqrt(fan_in))."""
    ks = jax.random.split(key, 12)

    def lin(kw, kb, fan_in, fan_out):
        bound = 1.0 / math.sqrt(fan_in)
        w = jax.random.uniform(kw, (fan_in, fan_out), jnp.float32, -bound, bound)
        b = jax.random.uniform(kb, (1, fan_out), jnp.float32, -bound, bound)
        return w, b

    wq, bq = lin(ks[0], ks[1], H, H)
    wk, bk = lin(ks[2], ks[3], H, H)
    wv, bv = lin(ks[4], ks[5], H, H)
    wo, bo = lin(ks[6], ks[7], H, H)
    w1, b1 = lin(ks[8], ks[9], H, pf)
    w2, b2 = lin(ks[10], ks[11], pf, H)
    return dict(
        wq=wq, bq=bq, wk=wk, bk=bk, wv=wv, bv=bv, wo=wo, bo=bo,
        ln1_w=jnp.ones((1, H), jnp.float32), ln1_b=jnp.zeros((1, H), jnp.float32),
        w1=w1, b1=b1, w2=w2, b2=b2,
        ln2_w=jnp.ones((1, H), jnp.float32), ln2_b=jnp.zeros((1, H), jnp.float32),
    )


def _reference(text, audio, p, n_heads):
    """Pure-JAX reference of the PyTorch forward (eval mode)."""
    B, Lq, H = text.shape
    hd = H // n_heads
    scale = math.sqrt(hd)

    q = text @ p["wq"] + p["bq"]
    k = audio @ p["wk"] + p["bk"]
    v = audio @ p["wv"] + p["bv"]

    def split(x):
        return x.reshape(B, -1, n_heads, hd).transpose(0, 2, 1, 3)

    Q, K, V = split(q), split(k), split(v)
    score = jnp.einsum("bhqd,bhkd->bhqk", Q, K) / scale
    alpha = jax.nn.softmax(score, axis=-1)
    x = jnp.einsum("bhqk,bhkd->bhqd", alpha, V)
    x = x.transpose(0, 2, 1, 3).reshape(B, Lq, H)
    attn = x @ p["wo"] + p["bo"]

    def ln(x, w, b):
        mu = x.mean(-1, keepdims=True)
        var = ((x - mu) ** 2).mean(-1, keepdims=True)
        return (x - mu) * jax.lax.rsqrt(var + 1e-5) * w + b

    x = ln(text + attn, p["ln1_w"], p["ln1_b"])
    ff = jnp.maximum(x @ p["w1"] + p["b1"], 0.0) @ p["w2"] + p["b2"]
    return ln(x + ff, p["ln2_w"], p["ln2_b"])


if __name__ == "__main__":
    B, Lq, Lk, H, n_heads, pf = 2, 8, 16, 32, 4, 64
    key = jax.random.PRNGKey(0)
    k_text, k_audio, k_params = jax.random.split(key, 3)

    text = jax.random.normal(k_text, (B, Lq, H), jnp.float32)
    audio = jax.random.normal(k_audio, (B, Lk, H), jnp.float32)
    params = _init_params(k_params, H, pf)

    ref = _reference(text, audio, params, n_heads)

    # Strict f32 path (matches the f32 reference to 1e-4).
    out_f32 = cross_attention_layer(text, audio, params, n_heads=n_heads,
                                    matmul_dtype=jnp.float32)
    out_f32 = jax.block_until_ready(out_f32)
    assert out_f32.shape == (B, Lq, H)
    assert jnp.allclose(out_f32, ref, atol=1e-4, rtol=1e-4), "f32 mismatch vs reference"

    # Production path: bf16 MXU operands (default) — looser tolerance from bf16 rounding.
    out_bf16 = cross_attention_layer(text, audio, params, n_heads=n_heads)
    out_bf16 = jax.block_until_ready(out_bf16)
    assert out_bf16.shape == (B, Lq, H)
    assert jnp.allclose(out_bf16, ref, atol=1e-1, rtol=1e-1), "bf16 mismatch vs reference"

    # TODO(synk): dropout is identity here (inference semantics); training-mode dropout masks not implemented.
    print("KERNEL_OK")
</pallas_src>

<mosaic_0001>
module attributes {stable_mosaic.version = 11 : i64} {
  func.func @_cross_attn_kernel(%arg0: i32, %arg1: i32, %arg2: memref<1x8x32xf32, #tpu.memory_space<vmem>>, %arg3: memref<1x16x32xf32, #tpu.memory_space<vmem>>, %arg4: memref<32x32xf32, #tpu.memory_space<vmem>>, %arg5: memref<1x32xf32, #tpu.memory_space<vmem>>, %arg6: memref<32x64xf32, #tpu.memory_space<vmem>>, %arg7: memref<1x64xf32, #tpu.memory_space<vmem>>, %arg8: memref<32x32xf32, #tpu.memory_space<vmem>>, %arg9: memref<1x32xf32, #tpu.memory_space<vmem>>, %arg10: memref<1x32xf32, #tpu.memory_space<vmem>>, %arg11: memref<1x32xf32, #tpu.memory_space<vmem>>, %arg12: memref<32x64xf32, #tpu.memory_space<vmem>>, %arg13: memref<1x64xf32, #tpu.memory_space<vmem>>, %arg14: memref<64x32xf32, #tpu.memory_space<vmem>>, %arg15: memref<1x32xf32, #tpu.memory_space<vmem>>, %arg16: memref<1x32xf32, #tpu.memory_space<vmem>>, %arg17: memref<1x32xf32, #tpu.memory_space<vmem>>, %arg18: memref<1x8x32xf32, #tpu.memory_space<vmem>>) attributes {dimension_semantics = [#tpu.dimension_semantics<parallel>, #tpu.dimension_semantics<parallel>], iteration_bounds = array<i64: 2, 1>, scalar_prefetch = 0 : i64, scratch_operands = 0 : i64, tpu.core_type = #tpu.core_type<tc>, window_params = [{transform_indices = @transform_0, window_bounds = array<i64: 1, 8, 32>}, {transform_indices = @transform_1, window_bounds = array<i64: 1, 16, 32>}, {pipeline_mode = #tpu.pipeline_mode<synchronous>, transform_indices = @transform_2, window_bounds = array<i64: 32, 32>}, {pipeline_mode = #tpu.pipeline_mode<synchronous>, transform_indices = @transform_3, window_bounds = array<i64: 1, 32>}, {pipeline_mode = #tpu.pipeline_mode<synchronous>, transform_indices = @transform_4, window_bounds = array<i64: 32, 64>}, {pipeline_mode = #tpu.pipeline_mode<synchronous>, transform_indices = @transform_5, window_bounds = array<i64: 1, 64>}, {pipeline_mode = #tpu.pipeline_mode<synchronous>, transform_indices = @transform_6, window_bounds = array<i64: 32, 32>}, {pipeline_mode = #tpu.pipeline_mode<synchronous>, transform_indices = @transform_7, window_bounds = array<i64: 1, 32>}, {pipeline_mode = #tpu.pipeline_mode<synchronous>, transform_indices = @transform_8, window_bounds = array<i64: 1, 32>}, {pipeline_mode = #tpu.pipeline_mode<synchronous>, transform_indices = @transform_9, window_bounds = array<i64: 1, 32>}, {pipeline_mode = #tpu.pipeline_mode<synchronous>, transform_indices = @transform_10, window_bounds = array<i64: 32, 64>}, {pipeline_mode = #tpu.pipeline_mode<synchronous>, transform_indices = @transform_11, window_bounds = array<i64: 1, 64>}, {pipeline_mode = #tpu.pipeline_mode<synchronous>, transform_indices = @transform_12, window_bounds = array<i64: 64, 32>}, {pipeline_mode = #tpu.pipeline_mode<synchronous>, transform_indices = @transform_13, window_bounds = array<i64: 1, 32>}, {pipeline_mode = #tpu.pipeline_mode<synchronous>, transform_indices = @transform_14, window_bounds = array<i64: 1, 32>}, {pipeline_mode = #tpu.pipeline_mode<synchronous>, transform_indices = @transform_15, window_bounds = array<i64: 1, 32>}, {transform_indices = @transform_16, window_bounds = array<i64: 1, 8, 32>}]} {
    %c0 = arith.constant 0 : index
    %c0_0 = arith.constant 0 : index
    %c0_1 = arith.constant 0 : index
    %0 = vector.load %arg2[%c0, %c0_0, %c0_1] : memref<1x8x32xf32, #tpu.memory_space<vmem>>, vector<1x8x32xf32>
    %1 = vector.shape_cast %0 : vector<1x8x32xf32> to vector<8x32xf32>
    %c0_2 = arith.constant 0 : index
    %c0_3 = arith.constant 0 : index
    %c0_4 = arith.constant 0 : index
    %2 = vector.load %arg3[%c0_2, %c0_3, %c0_4] : memref<1x16x32xf32, #tpu.memory_space<vmem>>, vector<1x16x32xf32>
    %3 = vector.shape_cast %2 : vector<1x16x32xf32> to vector<16x32xf32>
    %c0_5 = arith.constant 0 : index
    %c0_6 = arith.constant 0 : index
    %4 = vector.load %arg4[%c0_5, %c0_6] : memref<32x32xf32, #tpu.memory_space<vmem>>, vector<32x32xf32>
    %cst = arith.constant dense<0.000000e+00> : vector<8x32xf32>
    %5 = tpu.matmul %1, %4, %cst {dimension_numbers = #tpu.dot_dimension_numbers<[1], [0], [0], [1], [0, 0, 1, 1], [], []>} : vector<8x32xf32>, vector<32x32xf32>, vector<8x32xf32> -> vector<8x32xf32>
    %c0_7 = arith.constant 0 : index
    %c0_8 = arith.constant 0 : index
    %6 = vector.load %arg5[%c0_7, %c0_8] : memref<1x32xf32, #tpu.memory_space<vmem>>, vector<1x32xf32>
    %7 = vector.broadcast %6 : vector<1x32xf32> to vector<8x32xf32>
    %8 = arith.addf %5, %7 : vector<8x32xf32>
    %cst_9 = arith.constant 0.353553385 : f32
    %9 = vector.broadcast %cst_9 : f32 to vector<8x32xf32>
    %10 = arith.mulf %8, %9 : vector<8x32xf32>
    %c0_10 = arith.constant 0 : index
    %c0_11 = arith.constant 0 : index
    %11 = vector.load %arg6[%c0_10, %c0_11] : memref<32x64xf32, #tpu.memory_space<vmem>>, vector<32x64xf32>
    %cst_12 = arith.constant dense<0.000000e+00> : vector<16x64xf32>
    %12 = tpu.matmul %3, %11, %cst_12 {dimension_numbers = #tpu.dot_dimension_numbers<[1], [0], [0], [1], [0, 0, 1, 1], [], []>} : vector<16x32xf32>, vector<32x64xf32>, vector<16x64xf32> -> vector<16x64xf32>
    %c0_13 = arith.constant 0 : index
    %c0_14 = arith.constant 0 : index
    %13 = vector.load %arg7[%c0_13, %c0_14] : memref<1x64xf32, #tpu.memory_space<vmem>>, vector<1x64xf32>
    %14 = vector.broadcast %13 : vector<1x64xf32> to vector<16x64xf32>
    %15 = arith.addf %12, %14 : vector<16x64xf32>
    %16 = vector.extract_strided_slice %15 {offsets = [0, 0], sizes = [16, 32], strides = [1, 1]} : vector<16x64xf32> to vector<16x32xf32>
    %17 = vector.extract_strided_slice %15 {offsets = [0, 32], sizes = [16, 32], strides = [1, 1]} : vector<16x64xf32> to vector<16x32xf32>
    %18 = vector.shape_cast %10 : vector<8x32xf32> to vector<1x8x4x8xf32>
    %19 = tpu.transpose %18, [0, 2, 1, 3] : vector<1x8x4x8xf32> -> vector<1x4x8x8xf32>
    %20 = vector.shape_cast %19 : vector<1x4x8x8xf32> to vector<4x8x8xf32>
    %21 = vector.shape_cast %16 : vector<16x32xf32> to vector<1x16x4x8xf32>
    %22 = tpu.transpose %21, [0, 2, 1, 3] : vector<1x16x4x8xf32> -> vector<1x4x16x8xf32>
    %23 = vector.shape_cast %22 : vector<1x4x16x8xf32> to vector<4x16x8xf32>
    %24 = vector.shape_cast %17 : vector<16x32xf32> to vector<1x16x4x8xf32>
    %25 = tpu.transpose %24, [0, 2, 1, 3] : vector<1x16x4x8xf32> -> vector<1x4x16x8xf32>
    %26 = vector.shape_cast %25 : vector<1x4x16x8xf32> to vector<4x16x8xf32>
    "tpu.trace_start"() <{level = 10 : i32, message = "gqd,gkd->gqk"}> : () -> ()
    %cst_15 = arith.constant dense<0.000000e+00> : vector<4x8x16xf32>
    %27 = tpu.matmul %20, %23, %cst_15 {dimension_numbers = #tpu.dot_dimension_numbers<[2], [2], [1], [1], [0, 0, 0, 1, 1, 1], [0], [0]>} : vector<4x8x8xf32>, vector<4x16x8xf32>, vector<4x8x16xf32> -> vector<4x8x16xf32>
    "tpu.trace_stop"() : () -> ()
    %cst_16 = arith.constant dense<0xFF800000> : vector<4x8xf32>
    %28 = vector.multi_reduction <maximumf>, %27, %cst_16 [2] : vector<4x8x16xf32> to vector<4x8xf32>
    %29 = vector.shape_cast %28 : vector<4x8xf32> to vector<4x8x1xf32>
    %30 = vector.broadcast %29 : vector<4x8x1xf32> to vector<4x8x16xf32>
    %31 = arith.subf %27, %30 : vector<4x8x16xf32>
    %32 = math.exp %31 : vector<4x8x16xf32>
    %cst_17 = arith.constant dense<0.000000e+00> : vector<4x8xf32>
    %33 = vector.multi_reduction <add>, %32, %cst_17 [2] : vector<4x8x16xf32> to vector<4x8xf32>
    %34 = vector.shape_cast %33 : vector<4x8xf32> to vector<4x8x1xf32>
    %35 = tpu.reciprocal %34 : vector<4x8x1xf32> -> vector<4x8x1xf32>
    %36 = vector.broadcast %35 : vector<4x8x1xf32> to vector<4x8x16xf32>
    %37 = arith.mulf %32, %36 : vector<4x8x16xf32>
    "tpu.trace_start"() <{level = 10 : i32, message = "gqk,gkd->gqd"}> : () -> ()
    %cst_18 = arith.constant dense<0.000000e+00> : vector<4x8x8xf32>
    %38 = tpu.matmul %37, %26, %cst_18 {dimension_numbers = #tpu.dot_dimension_numbers<[2], [1], [1], [2], [0, 0, 0, 1, 1, 2], [0], [0]>} : vector<4x8x16xf32>, vector<4x16x8xf32>, vector<4x8x8xf32> -> vector<4x8x8xf32>
    "tpu.trace_stop"() : () -> ()
    %39 = vector.shape_cast %38 : vector<4x8x8xf32> to vector<1x4x8x8xf32>
    %40 = tpu.transpose %39, [0, 2, 1, 3] : vector<1x4x8x8xf32> -> vector<1x8x4x8xf32>
    %41 = vector.shape_cast %40 : vector<1x8x4x8xf32> to vector<8x32xf32>
    %c0_19 = arith.constant 0 : index
    %c0_20 = arith.constant 0 : index
    %42 = vector.load %arg8[%c0_19, %c0_20] : memref<32x32xf32, #tpu.memory_space<vmem>>, vector<32x32xf32>
    %cst_21 = arith.constant dense<0.000000e+00> : vector<8x32xf32>
    %43 = tpu.matmul %41, %42, %cst_21 {dimension_numbers = #tpu.dot_dimension_numbers<[1], [0], [0], [1], [0, 0, 1, 1], [], []>} : vector<8x32xf32>, vector<32x32xf32>, vector<8x32xf32> -> vector<8x32xf32>
    %c0_22 = arith.constant 0 : index
    %c0_23 = arith.constant 0 : index
    %44 = vector.load %arg9[%c0_22, %c0_23] : memref<1x32xf32, #tpu.memory_space<vmem>>, vector<1x32xf32>
    %45 = vector.broadcast %44 : vector<1x32xf32> to vector<8x32xf32>
    %46 = arith.addf %43, %45 : vector<8x32xf32>
    %47 = arith.addf %1, %46 : vector<8x32xf32>
    %cst_24 = arith.constant dense<0.000000e+00> : vector<8xf32>
    %48 = vector.multi_reduction <add>, %47, %cst_24 [1] : vector<8x32xf32> to vector<8xf32>
    %49 = vector.shape_cast %48 : vector<8xf32> to vector<8x1xf32>
    %cst_25 = arith.constant 3.200000e+01 : f32
    %50 = vector.broadcast %cst_25 : f32 to vector<8x1xf32>
    %51 = arith.divf %49, %50 : vector<8x1xf32>
    %52 = vector.broadcast %51 : vector<8x1xf32> to vector<8x32xf32>
    %53 = arith.subf %47, %52 : vector<8x32xf32>
    %54 = arith.mulf %53, %53 : vector<8x32xf32>
    %cst_26 = arith.constant dense<0.000000e+00> : vector<8xf32>
    %55 = vector.multi_reduction <add>, %54, %cst_26 [1] : vector<8x32xf32> to vector<8xf32>
    %56 = vector.shape_cast %55 : vector<8xf32> to vector<8x1xf32>
    %cst_27 = arith.constant 3.200000e+01 : f32
    %57 = vector.broadcast %cst_27 : f32 to vector<8x1xf32>
    %58 = arith.divf %56, %57 : vector<8x1xf32>
    %59 = vector.broadcast %51 : vector<8x1xf32> to vector<8x32xf32>
    %60 = arith.subf %47, %59 : vector<8x32xf32>
    %cst_28 = arith.constant 9.99999974E-6 : f32
    %61 = vector.broadcast %cst_28 : f32 to vector<8x1xf32>
    %62 = arith.addf %58, %61 : vector<8x1xf32>
    %63 = math.rsqrt %62 : vector<8x1xf32>
    %64 = vector.broadcast %63 : vector<8x1xf32> to vector<8x32xf32>
    %65 = arith.mulf %60, %64 : vector<8x32xf32>
    %c0_29 = arith.constant 0 : index
    %c0_30 = arith.constant 0 : index
    %66 = vector.load %arg10[%c0_29, %c0_30] : memref<1x32xf32, #tpu.memory_space<vmem>>, vector<1x32xf32>
    %67 = vector.broadcast %66 : vector<1x32xf32> to vector<8x32xf32>
    %68 = arith.mulf %65, %67 : vector<8x32xf32>
    %c0_31 = arith.constant 0 : index
    %c0_32 = arith.constant 0 : index
    %69 = vector.load %arg11[%c0_31, %c0_32] : memref<1x32xf32, #tpu.memory_space<vmem>>, vector<1x32xf32>
    %70 = vector.broadcast %69 : vector<1x32xf32> to vector<8x32xf32>
    %71 = arith.addf %68, %70 : vector<8x32xf32>
    %c0_33 = arith.constant 0 : index
    %c0_34 = arith.constant 0 : index
    %72 = vector.load %arg12[%c0_33, %c0_34] : memref<32x64xf32, #tpu.memory_space<vmem>>, vector<32x64xf32>
    %cst_35 = arith.constant dense<0.000000e+00> : vector<8x64xf32>
    %73 = tpu.matmul %71, %72, %cst_35 {dimension_numbers = #tpu.dot_dimension_numbers<[1], [0], [0], [1], [0, 0, 1, 1], [], []>} : vector<8x32xf32>, vector<32x64xf32>, vector<8x64xf32> -> vector<8x64xf32>
    %c0_36 = arith.constant 0 : index
    %c0_37 = arith.constant 0 : index
    %74 = vector.load %arg13[%c0_36, %c0_37] : memref<1x64xf32, #tpu.memory_space<vmem>>, vector<1x64xf32>
    %75 = vector.broadcast %74 : vector<1x64xf32> to vector<8x64xf32>
    %76 = arith.addf %73, %75 : vector<8x64xf32>
    %cst_38 = arith.constant 0.000000e+00 : f32
    %77 = vector.broadcast %cst_38 : f32 to vector<8x64xf32>
    %78 = arith.maximumf %76, %77 : vector<8x64xf32>
    %c0_39 = arith.constant 0 : index
    %c0_40 = arith.constant 0 : index
    %79 = vector.load %arg14[%c0_39, %c0_40] : memref<64x32xf32, #tpu.memory_space<vmem>>, vector<64x32xf32>
    %cst_41 = arith.constant dense<0.000000e+00> : vector<8x32xf32>
    %80 = tpu.matmul %78, %79, %cst_41 {dimension_numbers = #tpu.dot_dimension_numbers<[1], [0], [0], [1], [0, 0, 1, 1], [], []>} : vector<8x64xf32>, vector<64x32xf32>, vector<8x32xf32> -> vector<8x32xf32>
    %c0_42 = arith.constant 0 : index
    %c0_43 = arith.constant 0 : index
    %81 = vector.load %arg15[%c0_42, %c0_43] : memref<1x32xf32, #tpu.memory_space<vmem>>, vector<1x32xf32>
    %82 = vector.broadcast %81 : vector<1x32xf32> to vector<8x32xf32>
    %83 = arith.addf %80, %82 : vector<8x32xf32>
    %84 = arith.addf %71, %83 : vector<8x32xf32>
    %cst_44 = arith.constant dense<0.000000e+00> : vector<8xf32>
    %85 = vector.multi_reduction <add>, %84, %cst_44 [1] : vector<8x32xf32> to vector<8xf32>
    %86 = vector.shape_cast %85 : vector<8xf32> to vector<8x1xf32>
    %cst_45 = arith.constant 3.200000e+01 : f32
    %87 = vector.broadcast %cst_45 : f32 to vector<8x1xf32>
    %88 = arith.divf %86, %87 : vector<8x1xf32>
    %89 = vector.broadcast %88 : vector<8x1xf32> to vector<8x32xf32>
    %90 = arith.subf %84, %89 : vector<8x32xf32>
    %91 = arith.mulf %90, %90 : vector<8x32xf32>
    %cst_46 = arith.constant dense<0.000000e+00> : vector<8xf32>
    %92 = vector.multi_reduction <add>, %91, %cst_46 [1] : vector<8x32xf32> to vector<8xf32>
    %93 = vector.shape_cast %92 : vector<8xf32> to vector<8x1xf32>
    %cst_47 = arith.constant 3.200000e+01 : f32
    %94 = vector.broadcast %cst_47 : f32 to vector<8x1xf32>
    %95 = arith.divf %93, %94 : vector<8x1xf32>
    %96 = vector.broadcast %88 : vector<8x1xf32> to vector<8x32xf32>
    %97 = arith.subf %84, %96 : vector<8x32xf32>
    %cst_48 = arith.constant 9.99999974E-6 : f32
    %98 = vector.broadcast %cst_48 : f32 to vector<8x1xf32>
    %99 = arith.addf %95, %98 : vector<8x1xf32>
    %100 = math.rsqrt %99 : vector<8x1xf32>
    %101 = vector.broadcast %100 : vector<8x1xf32> to vector<8x32xf32>
    %102 = arith.mulf %97, %101 : vector<8x32xf32>
    %c0_49 = arith.constant 0 : index
    %c0_50 = arith.constant 0 : index
    %103 = vector.load %arg16[%c0_49, %c0_50] : memref<1x32xf32, #tpu.memory_space<vmem>>, vector<1x32xf32>
    %104 = vector.broadcast %103 : vector<1x32xf32> to vector<8x32xf32>
    %105 = arith.mulf %102, %104 : vector<8x32xf32>
    %c0_51 = arith.constant 0 : index
    %c0_52 = arith.constant 0 : index
    %106 = vector.load %arg17[%c0_51, %c0_52] : memref<1x32xf32, #tpu.memory_space<vmem>>, vector<1x32xf32>
    %107 = vector.broadcast %106 : vector<1x32xf32> to vector<8x32xf32>
    %108 = arith.addf %105, %107 : vector<8x32xf32>
    %109 = vector.shape_cast %108 : vector<8x32xf32> to vector<1x8x32xf32>
    %c0_53 = arith.constant 0 : index
    %c0_54 = arith.constant 0 : index
    %c0_55 = arith.constant 0 : index
    %110 = vector.load %arg18[%c0_53, %c0_54, %c0_55] : memref<1x8x32xf32, #tpu.memory_space<vmem>>, vector<1x8x32xf32>
    tpu.vector_store %arg18[%c0_53, %c0_54, %c0_55], %109 {strides = array<i32>} : memref<1x8x32xf32, #tpu.memory_space<vmem>>, vector<1x8x32xf32>,
    return
  }
  func.func @transform_0(%arg0: i32, %arg1: i32) -> (i32, i32, i32) {
    %c0_i32 = arith.constant 0 : i32
    %c0_i32_0 = arith.constant 0 : i32
    return %arg0, %arg1, %c0_i32 : i32, i32, i32
  }
  func.func @transform_1(%arg0: i32, %arg1: i32) -> (i32, i32, i32) {
    %c0_i32 = arith.constant 0 : i32
    %c0_i32_0 = arith.constant 0 : i32
    %c0_i32_1 = arith.constant 0 : i32
    return %arg0, %c0_i32, %c0_i32_0 : i32, i32, i32
  }
  func.func @transform_2(%arg0: i32, %arg1: i32) -> (i32, i32) {
    %c0_i32 = arith.constant 0 : i32
    %c0_i32_0 = arith.constant 0 : i32
    %c0_i32_1 = arith.constant 0 : i32
    return %c0_i32, %c0_i32_0 : i32, i32
  }
  func.func @transform_3(%arg0: i32, %arg1: i32) -> (i32, i32) {
    %c0_i32 = arith.constant 0 : i32
    %c0_i32_0 = arith.constant 0 : i32
    %c0_i32_1 = arith.constant 0 : i32
    return %c0_i32, %c0_i32_0 : i32, i32
  }
  func.func @transform_4(%arg0: i32, %arg1: i32) -> (i32, i32) {
    %c0_i32 = arith.constant 0 : i32
    %c0_i32_0 = arith.constant 0 : i32
    %c0_i32_1 = arith.constant 0 : i32
    return %c0_i32, %c0_i32_0 : i32, i32
  }
  func.func @transform_5(%arg0: i32, %arg1: i32) -> (i32, i32) {
    %c0_i32 = arith.constant 0 : i32
    %c0_i32_0 = arith.constant 0 : i32
    %c0_i32_1 = arith.constant 0 : i32
    return %c0_i32, %c0_i32_0 : i32, i32
  }
  func.func @transform_6(%arg0: i32, %arg1: i32) -> (i32, i32) {
    %c0_i32 = arith.constant 0 : i32
    %c0_i32_0 = arith.constant 0 : i32
    %c0_i32_1 = arith.constant 0 : i32
    return %c0_i32, %c0_i32_0 : i32, i32
  }
  func.func @transform_7(%arg0: i32, %arg1: i32) -> (i32, i32) {
    %c0_i32 = arith.constant 0 : i32
    %c0_i32_0 = arith.constant 0 : i32
    %c0_i32_1 = arith.constant 0 : i32
    return %c0_i32, %c0_i32_0 : i32, i32
  }
  func.func @transform_8(%arg0: i32, %arg1: i32) -> (i32, i32) {
    %c0_i32 = arith.constant 0 : i32
    %c0_i32_0 = arith.constant 0 : i32
    %c0_i32_1 = arith.constant 0 : i32
    return %c0_i32, %c0_i32_0 : i32, i32
  }
  func.func @transform_9(%arg0: i32, %arg1: i32) -> (i32, i32) {
    %c0_i32 = arith.constant 0 : i32
    %c0_i32_0 = arith.constant 0 : i32
    %c0_i32_1 = arith.constant 0 : i32
    return %c0_i32, %c0_i32_0 : i32, i32
  }
  func.func @transform_10(%arg0: i32, %arg1: i32) -> (i32, i32) {
    %c0_i32 = arith.constant 0 : i32
    %c0_i32_0 = arith.constant 0 : i32
    %c0_i32_1 = arith.constant 0 : i32
    return %c0_i32, %c0_i32_0 : i32, i32
  }
  func.func @transform_11(%arg0: i32, %arg1: i32) -> (i32, i32) {
    %c0_i32 = arith.constant 0 : i32
    %c0_i32_0 = arith.constant 0 : i32
    %c0_i32_1 = arith.constant 0 : i32
    return %c0_i32, %c0_i32_0 : i32, i32
  }
  func.func @transform_12(%arg0: i32, %arg1: i32) -> (i32, i32) {
    %c0_i32 = arith.constant 0 : i32
    %c0_i32_0 = arith.constant 0 : i32
    %c0_i32_1 = arith.constant 0 : i32
    return %c0_i32, %c0_i32_0 : i32, i32
  }
  func.func @transform_13(%arg0: i32, %arg1: i32) -> (i32, i32) {
    %c0_i32 = arith.constant 0 : i32
    %c0_i32_0 = arith.constant 0 : i32
    %c0_i32_1 = arith.constant 0 : i32
    return %c0_i32, %c0_i32_0 : i32, i32
  }
  func.func @transform_14(%arg0: i32, %arg1: i32) -> (i32, i32) {
    %c0_i32 = arith.constant 0 : i32
    %c0_i32_0 = arith.constant 0 : i32
    %c0_i32_1 = arith.constant 0 : i32
    return %c0_i32, %c0_i32_0 : i32, i32
  }
  func.func @transform_15(%arg0: i32, %arg1: i32) -> (i32, i32) {
    %c0_i32 = arith.constant 0 : i32
    %c0_i32_0 = arith.constant 0 : i32
    %c0_i32_1 = arith.constant 0 : i32
    return %c0_i32, %c0_i32_0 : i32, i32
  }
  func.func @transform_16(%arg0: i32, %arg1: i32) -> (i32, i32, i32) {
    %c0_i32 = arith.constant 0 : i32
    %c0_i32_0 = arith.constant 0 : i32
    return %arg0, %arg1, %c0_i32 : i32, i32, i32
  }
}

</mosaic_0001>

<bundles_post_ra>
// kernel: tpu_custom_call.1
= control target key start
LH: loop header
LB: loop body
LE: loop exit
PB: predicated region body
PF: predicated region fallthrough
CT: control target
= control target key end

     0   :  { %s5159_s0 = inlined_call_operand.hbm [shape: f32[2,8,32], index: 0, kind: input, shape index: {}]   ;;  %s5160_s1 = inlined_call_operand.hbm [shape: f32[2,16,32], index: 1, kind: input, shape index: {}]   ;;  %s5161_s2 = inlined_call_operand.hbm [shape: f32[32,32], index: 2, kind: input, shape index: {}]   ;;  %s5162_s3 = inlined_call_operand.hbm [shape: f32[1,32], index: 3, kind: input, shape index: {}]   ;;  %s5163_s4 = inlined_call_operand.hbm [shape: f32[32,64], index: 4, kind: input, shape index: {}]   ;;  %s5164_s5 = inlined_call_operand.hbm [shape: f32[1,64], index: 5, kind: input, shape index: {}]   ;;  %s5165_s6 = inlined_call_operand.hbm [shape: f32[32,32], index: 6, kind: input, shape index: {}]   ;;  %s5166_s7 = inlined_call_operand.hbm [shape: f32[1,32], index: 7, kind: input, shape index: {}]   ;;  %s5167_s8 = inlined_call_operand.hbm [shape: f32[1,32], index: 8, kind: input, shape index: {}]   ;;  %s5168_s9 = inlined_call_operand.hbm [shape: f32[1,32], index: 9, kind: input, shape index: {}]   ;;  %s5169_s10 = inlined_call_operand.hbm [shape: f32[32,64], index: 10, kind: input, shape index: {}]   ;;  %s5170_s11 = inlined_call_operand.hbm [shape: f32[1,64], index: 11, kind: input, shape index: {}]   ;;  %s5171_s12 = inlined_call_operand.hbm [shape: f32[64,32], index: 12, kind: input, shape index: {}]   ;;  %s5172_s13 = inlined_call_operand.hbm [shape: f32[1,32], index: 13, kind: input, shape index: {}]   ;;  %s5173_s14 = inlined_call_operand.hbm [shape: f32[1,32], index: 14, kind: input, shape index: {}]   ;;  %s5174_s15 = inlined_call_operand.hbm [shape: f32[1,32], index: 15, kind: input, shape index: {}]   ;;  %s5175_s16 = inlined_call_operand.hbm [shape: f32[2,8,32], index: 16, kind: output, shape index: {}]  }
   0x1   :  { %5193 = sst [smem:[#allocation47_spill]] %s5159_s0 }
   0x2   :  { %5194 = sst [smem:[#allocation48_spill]] %s5160_s1 }
   0x3   :  { %5195 = sst [smem:[#allocation49_spill]] %s5161_s2 }
   0x4   :  { %5196 = sst [smem:[#allocation50_spill]] %s5162_s3 }
   0x5   :  { %5197 = sst [smem:[#allocation51_spill]] %s5163_s4 }
   0x6   :  { %5198 = sst [smem:[#allocation52_spill]] %s5164_s5 }
   0x7   :  { %5199 = sst [smem:[#allocation53_spill]] %s5165_s6 }
   0x8   :  { %5200 = sst [smem:[#allocation54_spill]] %s5166_s7 }
   0x9   :  { %5201 = sst [smem:[#allocation55_spill]] %s5167_s8 }
   0xa   :  { %5202 = sst [smem:[#allocation56_spill]] %s5175_s16 }
   0xb   :  { %21 = vsyncpa [#allocation3], 0 }
   0xc   :  { %23 = vsyncpa [#allocation3 + $0x1], 0 }
   0xd   :  { %24 = vsyncpa [#allocation6], 0 }
   0xe   :  { %26 = vsyncpa [#allocation6 + $0x1], 0 }
   0xf   :  { %27 = vsyncpa [#allocation9], 0 }
  0x10   :  { %28 = vsyncpa [#allocation12], 0 }
  0x11   :  { %29 = vsyncpa [#allocation15], 0 }
  0x12   :  { %30 = vsyncpa [#allocation18], 0 }
  0x13   :  { %31 = vsyncpa [#allocation21], 0 }
  0x14   :  { %32 = vsyncpa [#allocation24], 0 }
  0x15   :  { %33 = vsyncpa [#allocation27], 0 }
  0x16   :  { %34 = vsyncpa [#allocation4], 0 }
  0x17   :  { %36 = vsyncpa [#allocation4 + $0x1], 0  ;;  %s4329_s21 = smov 0   ;;  %s4331_s22 = smov 0  }
  0x18   :  { %s4333_s23 = smov 0   ;;  %s4335_s24 = smov 0  }
  0x19   :  { %s4337_s25 = smov 0   ;;  %s4339_s26 = smov 0  }
  0x1a LB: > { %5203 = sst [smem:[#allocation40_spill]] %s4191_s21  ;;  %s4360_s27 = sadd.s32 4294967295, %s4211_s26   ;;  %s4211_s26 = sphi %s4339_s26, %s42_s26   ;;  %s4207_s25 = sphi %s4337_s25, %s5268_s25   ;;  %s4203_s24 = sphi %s4335_s24, %s5266_s24   ;;  %s4199_s23 = sphi %s4333_s23, %s5267_s23   ;;  %s4195_s22 = sphi %s4331_s22, %s5265_s22   ;;  %s4191_s21 = sphi %s4329_s21, %s5264_s21  }
  0x1b   : > { %5204 = sst [smem:[#allocation41_spill]] %s4195_s22  ;;  %p3073_p0 = scmp.ge.s32.totalorder %s4211_s26, 1 }
  0x1c   : > { %5205 = sst [smem:[#allocation42_spill]] %s4199_s23  ;;  %p5186_p1 = scmp.eq.s32.totalorder %s4360_s27, 0 }
  0x1d   : > { %5206 = sst [smem:[#allocation43_spill]] %s4203_s24  ;;  %p435_p2 = scmp.lt.s32.totalorder %s4211_s26, 3 }
  0x1e   : > { %5207 = sst [smem:[#allocation44_spill]] %s4207_s25  ;;  %s4213_s29 = smov [#allocation7]  }
  0x1f   : > { %5208 = sst [smem:[#allocation45_spill]] %s4360_s27  ;;  %p4365_p3 = pnand %p3073_p0, %p435_p2 }
  0x20   : > { %s447_s30 = sshll.u32 %s4213_s29, 4  ;;  %s4214_s17 = smov [#allocation8]   ;;  %s4369_s30 = int_to_ptr.vmem [resolvable:$true] %s447_s30 }
  0x21   : > { %s5209_s28 = scalar_select %p4365_p3, 1, 0 }
  0x22   : > { %p3461_p4 = pneg %p4365_p3  ;;  %s461_s18 = sshll.u32 %s4214_s17, 4  ;;  %s4380_s18 = int_to_ptr.vmem [resolvable:$true] %s461_s18 }
  0x23   : > { %5210 = sst [smem:[#allocation46_spill]] %s5209_s28  ;;  %s4215_s19 = smov [#allocation11]  }
  0x24   : > { %p4376_p6 = pnand %p3461_p4, %p5186_p1  ;;  %s4382_s20 = sshll.u32 %s4215_s19, 4  ;;  %s486_s20 = int_to_ptr.vmem [resolvable:$true] %s4382_s20 }
  0x25   : > { %s5212_s2 = sld [smem:[#allocation49_spill]] }
  0x26   : > { %p4392_p8 = pneg %p4376_p6 }
  0x2b   : > { %s3641_s24 = scalar_lea.hbm %s5212_s2, 512 }
  0x2c   : > { %p3642_p7 = scmp.ne.s32.totalorder %s5212_s2, %s3641_s24  ;;  %p3648_p11 = scmp.lt.u32.totalorder %s3641_s24, %s5212_s2 }
  0x2e   : > { %p3644_p9 = pnand %p4392_p8, %p3642_p7 }
  0x30   : > { %p3645_p10 = pneg %p3644_p9 }
  0x32   : > { %p3650_p12 = pnand %p3648_p11, %p3645_p10 }
  0x34   : > { %3653 = shalt.err (!%p3650_p12)
}
  0x35   : > { %s3654_s1 = scalar_lea.vmem %s4369_s30, 512  ;;  %p3662_p4 = scmp.lt.s32.totalorder %s4369_s30, %s4369_s30 }
  0x36   : > { %p3655_p13 = scmp.ne.s32.totalorder %s4369_s30, %s3654_s1  ;;  %p3663_p5 = scmp.lt.s32.totalorder %s3654_s1, %s3654_s1 }
  0x38   : > { %p3657_p0 = pnand %p3655_p13, %p4392_p8  ;;  %p3664_p7 = por %p3663_p5, %p3662_p4 }
  0x3a   : > { %p3658_p2 = pneg %p3657_p0 }
  0x3c   : > { %p3665_p9 = pnand %p3664_p7, %p3658_p2 }
  0x3e   : > { %3668 = shalt.err (!%p3665_p9)
}
  0x3f   : > { %s5188_s16 = smov 128   ;;  %s5190_s24 = smov 8  }
  0x40   : > { %3464 = dma.hbm_to_vmem [thread:$0]  (!%p4376_p6), %s5212_s2, 512, %s4369_s30, [#allocation6], %s5188_s16, %s5188_s16, %s5190_s24  }
  0x41   : > { %s5214_s3 = sld [smem:[#allocation50_spill]] }
  0x47   : > { %s3669_s1 = scalar_lea.hbm %s5214_s3, 16 }
  0x48   : > { %p3670_p5 = scmp.ne.s32.totalorder %s5214_s3, %s3669_s1  ;;  %p3676_p12 = scmp.lt.u32.totalorder %s3669_s1, %s5214_s3 }
  0x4a   : > { %p3672_p10 = pnand %p3670_p5, %p4392_p8 }
  0x4c   : > { %p3673_p11 = pneg %p3672_p10 }
  0x4e   : > { %p3678_p13 = pnand %p3676_p12, %p3673_p11 }
  0x50   : > { %3681 = shalt.err (!%p3678_p13)
}
  0x51   : > { %s3682_s30 = scalar_lea.vmem %s4380_s18, 16  ;;  %s3689_s21 = scalar_lea.vmem %s4380_s18, 32 }
  0x52   : > { %p3683_p0 = scmp.ne.s32.totalorder %s4380_s18, %s3682_s30  ;;  %p3690_p7 = scmp.lt.s32.totalorder %s4380_s18, %s4380_s18 }
  0x53   : > { %p3691_p9 = scmp.lt.s32.totalorder %s3689_s21, %s3682_s30 }
  0x54   : > { %p3685_p2 = pnand %p3683_p0, %p4392_p8 }
  0x55   : > { %p3692_p5 = por %p3691_p9, %p3690_p7 }
  0x56   : > { %p3686_p4 = pneg %p3685_p2 }
  0x58   : > { %p3693_p10 = pnand %p3692_p5, %p3686_p4 }
  0x5a   : > { %3696 = shalt.err (!%p3693_p10)
}
  0x5b   : > { %3467 = dma.hbm_to_vmem [thread:$0]  (!%p4376_p6), %s5214_s3, 16, %s4380_s18, [#allocation9]  }
  0x5c   : > { %s5215_s5 = sld [smem:[#allocation52_spill]] }
  0x62   : > { %s3697_s29 = scalar_lea.hbm %s5215_s5, 16 }
  0x63   : > { %p3698_p11 = scmp.ne.s32.totalorder %s5215_s5, %s3697_s29  ;;  %p3704_p0 = scmp.lt.u32.totalorder %s3697_s29, %s5215_s5 }
  0x65   : > { %p3700_p12 = pnand %p3698_p11, %p4392_p8 }
  0x67   : > { %p3701_p13 = pneg %p3700_p12 }
  0x69   : > { %p3706_p2 = pnand %p3704_p0, %p3701_p13 }
  0x6b   : > { %3709 = shalt.err (!%p3706_p2)
}
  0x6c   : > { %s3710_s21 = scalar_lea.vmem %s486_s20, 16  ;;  %s3717_s18 = scalar_lea.vmem %s486_s20, 32 }
  0x6d   : > { %p3711_p4 = scmp.ne.s32.totalorder %s486_s20, %s3710_s21  ;;  %p3718_p5 = scmp.lt.s32.totalorder %s486_s20, %s486_s20 }
  0x6e   : > { %p3719_p10 = scmp.lt.s32.totalorder %s3717_s18, %s3710_s21 }
  0x6f   : > { %p3713_p7 = pnand %p3711_p4, %p4392_p8 }
  0x70   : > { %p3720_p1 = por %p3719_p10, %p3718_p5 }
  0x71   : > { %p3714_p9 = pneg %p3713_p7 }
  0x73   : > { %p3721_p3 = pnand %p3720_p1, %p3714_p9 }
  0x75   : > { %3724 = shalt.err (!%p3721_p3)
}
  0x76   : > { %3473 = dma.hbm_to_vmem [thread:$0]  (!%p4376_p6), %s5215_s5, 16, %s486_s20, [#allocation12]  }
  0x77   : > { %s4218_s25 = smov [#allocation14]   ;;  %s4219_s29 = smov [#allocation17]  }
  0x78   : > { %s509_s28 = sshll.u32 %s4218_s25, 4  ;;  %s531_s17 = sshll.u32 %s4219_s29, 4  ;;  %s510_s28 = int_to_ptr.vmem [resolvable:$true] %s509_s28  ;;  %s532_s17 = int_to_ptr.vmem [resolvable:$true] %s531_s17 }
  0x79   : > { %s5216_s7 = sld [smem:[#allocation54_spill]] }
  0x7f   : > { %s3725_s30 = scalar_lea.hbm %s5216_s7, 16 }
  0x80   : > { %p3726_p1 = scmp.ne.s32.totalorder %s5216_s7, %s3725_s30  ;;  %p3732_p12 = scmp.lt.u32.totalorder %s3725_s30, %s5216_s7 }
  0x82   : > { %p3728_p3 = pnand %p3726_p1, %p4392_p8 }
  0x84   : > { %p3729_p11 = pneg %p3728_p3 }
  0x86   : > { %p3734_p13 = pnand %p3732_p12, %p3729_p11 }
  0x88   : > { %3737 = shalt.err (!%p3734_p13)
}
  0x89   : > { %s3738_s20 = scalar_lea.vmem %s510_s28, 16  ;;  %s3745_s23 = scalar_lea.vmem %s510_s28, 32 }
  0x8a   : > { %p3739_p0 = scmp.ne.s32.totalorder %s510_s28, %s3738_s20  ;;  %p3746_p7 = scmp.lt.s32.totalorder %s510_s28, %s510_s28 }
  0x8b   : > { %p3747_p9 = scmp.lt.s32.totalorder %s3745_s23, %s3738_s20 }
  0x8c   : > { %p3741_p2 = pnand %p3739_p0, %p4392_p8 }
  0x8d   : > { %p3748_p5 = por %p3747_p9, %p3746_p7 }
  0x8e   : > { %p3742_p4 = pneg %p3741_p2 }
  0x90   : > { %p3749_p10 = pnand %p3748_p5, %p3742_p4 }
  0x92   : > { %3752 = shalt.err (!%p3749_p10)
}
  0x93   : > { %3479 = dma.hbm_to_vmem [thread:$0]  (!%p4376_p6), %s5216_s7, 16, %s510_s28, [#allocation15]  }
  0x94   : > { %s3753_s1 = scalar_lea.hbm %s5168_s9, 16 }
  0x95   : > { %p3754_p1 = scmp.ne.s32.totalorder %s5168_s9, %s3753_s1  ;;  %p3760_p12 = scmp.lt.u32.totalorder %s3753_s1, %s5168_s9 }
  0x97   : > { %p3756_p3 = pnand %p3754_p1, %p4392_p8 }
  0x99   : > { %p3757_p11 = pneg %p3756_p3 }
  0x9b   : > { %p3762_p13 = pnand %p3760_p12, %p3757_p11 }
  0x9d   : > { %3765 = shalt.err (!%p3762_p13)
}
  0x9e   : > { %s3766_s20 = scalar_lea.vmem %s532_s17, 16  ;;  %s3773_s28 = scalar_lea.vmem %s532_s17, 32 }
  0x9f   : > { %p3767_p0 = scmp.ne.s32.totalorder %s532_s17, %s3766_s20  ;;  %p3774_p7 = scmp.lt.s32.totalorder %s532_s17, %s532_s17 }
  0xa0   : > { %p3775_p9 = scmp.lt.s32.totalorder %s3773_s28, %s3766_s20 }
  0xa1   : > { %p3769_p2 = pnand %p3767_p0, %p4392_p8 }
  0xa2   : > { %p3776_p5 = por %p3775_p9, %p3774_p7 }
  0xa3   : > { %p3770_p4 = pneg %p3769_p2 }
  0xa5   : > { %p3777_p10 = pnand %p3776_p5, %p3770_p4 }
  0xa7   : > { %3780 = shalt.err (!%p3777_p10)
}
  0xa8   : > { %3485 = dma.hbm_to_vmem [thread:$0]  (!%p4376_p6), %s5168_s9, 16, %s532_s17, [#allocation18]  }
  0xa9   : > { %s4220_s29 = smov [#allocation20]   ;;  %s4221_s19 = smov [#allocation23]  }
  0xaa   : > { %s555_s16 = sshll.u32 %s4220_s29, 4  ;;  %s579_s1 = sshll.u32 %s4221_s19, 4  ;;  %s556_s16 = int_to_ptr.vmem [resolvable:$true] %s555_s16  ;;  %s580_s1 = int_to_ptr.vmem [resolvable:$true] %s579_s1 }
  0xab   : > { %s3781_s18 = scalar_lea.hbm %s5170_s11, 16 }
  0xac   : > { %p3782_p1 = scmp.ne.s32.totalorder %s5170_s11, %s3781_s18  ;;  %p3788_p12 = scmp.lt.u32.totalorder %s3781_s18, %s5170_s11 }
  0xae   : > { %p3784_p3 = pnand %p3782_p1, %p4392_p8 }
  0xb0   : > { %p3785_p11 = pneg %p3784_p3 }
  0xb2   : > { %p3790_p13 = pnand %p3788_p12, %p3785_p11 }
  0xb4   : > { %3793 = shalt.err (!%p3790_p13)
}
  0xb5   : > { %s3794_s17 = scalar_lea.vmem %s556_s16, 16  ;;  %s3801_s25 = scalar_lea.vmem %s556_s16, 32 }
  0xb6   : > { %p3795_p0 = scmp.ne.s32.totalorder %s556_s16, %s3794_s17  ;;  %p3802_p7 = scmp.lt.s32.totalorder %s556_s16, %s556_s16 }
  0xb7   : > { %p3803_p9 = scmp.lt.s32.totalorder %s3801_s25, %s3794_s17 }
  0xb8   : > { %p3797_p2 = pnand %p3795_p0, %p4392_p8 }
  0xb9   : > { %p3804_p5 = por %p3803_p9, %p3802_p7 }
  0xba   : > { %p3798_p4 = pneg %p3797_p2 }
  0xbc   : > { %p3805_p10 = pnand %p3804_p5, %p3798_p4 }
  0xbe   : > { %3808 = shalt.err (!%p3805_p10)
}
  0xbf   : > { %3491 = dma.hbm_to_vmem [thread:$0]  (!%p4376_p6), %s5170_s11, 16, %s556_s16, [#allocation21]  }
  0xc0   : > { %s3809_s18 = scalar_lea.hbm %s5172_s13, 16 }
  0xc1   : > { %p3810_p1 = scmp.ne.s32.totalorder %s5172_s13, %s3809_s18  ;;  %p3816_p12 = scmp.lt.u32.totalorder %s3809_s18, %s5172_s13 }
  0xc3   : > { %p3812_p3 = pnand %p3810_p1, %p4392_p8 }
  0xc5   : > { %p3813_p11 = pneg %p3812_p3 }
  0xc7   : > { %p3818_p13 = pnand %p3816_p12, %p3813_p11 }
  0xc9   : > { %3821 = shalt.err (!%p3818_p13)
}
  0xca   : > { %s3822_s17 = scalar_lea.vmem %s580_s1, 16  ;;  %s3829_s16 = scalar_lea.vmem %s580_s1, 32 }
  0xcb   : > { %p3823_p0 = scmp.ne.s32.totalorder %s580_s1, %s3822_s17  ;;  %p3830_p7 = scmp.lt.s32.totalorder %s580_s1, %s580_s1 }
  0xcc   : > { %p3831_p9 = scmp.lt.s32.totalorder %s3829_s16, %s3822_s17 }
  0xcd   : > { %p3825_p2 = pnand %p3823_p0, %p4392_p8 }
  0xce   : > { %p3832_p5 = por %p3831_p9, %p3830_p7 }
  0xcf   : > { %p3826_p4 = pneg %p3825_p2 }
  0xd1   : > { %p3833_p10 = pnand %p3832_p5, %p3826_p4 }
  0xd3   : > { %3836 = shalt.err (!%p3833_p10)
}
  0xd4   : > { %3497 = dma.hbm_to_vmem [thread:$0]  (!%p4376_p6), %s5172_s13, 16, %s580_s1, [#allocation24]  }
  0xd5   : > { %s4222_s19 = smov [#allocation10]   ;;  %s4223_s21 = smov [#allocation13]  }
  0xd6   : > { %s471_s30 = sshll.u32 %s4222_s19, 4  ;;  %s495_s18 = sshll.u32 %s4223_s21, 4  ;;  %s472_s30 = int_to_ptr.vmem [resolvable:$true] %s471_s30  ;;  %s496_s18 = int_to_ptr.vmem [resolvable:$true] %s495_s18 }
  0xd7   : > { %s5217_s4 = sld [smem:[#allocation51_spill]] }
  0xdd   : > { %s3837_s28 = scalar_lea.hbm %s5217_s4, 512 }
  0xde   : > { %p3838_p1 = scmp.ne.s32.totalorder %s5217_s4, %s3837_s28  ;;  %p3844_p12 = scmp.lt.u32.totalorder %s3837_s28, %s5217_s4 }
  0xe0   : > { %p3840_p3 = pnand %p3838_p1, %p4392_p8 }
  0xe2   : > { %p3841_p11 = pneg %p3840_p3 }
  0xe4   : > { %p3846_p13 = pnand %p3844_p12, %p3841_p11 }
  0xe6   : > { %3849 = shalt.err (!%p3846_p13)
}
  0xe7   : > { %s3850_s1 = scalar_lea.vmem %s472_s30, 512  ;;  %p3858_p7 = scmp.lt.s32.totalorder %s472_s30, %s472_s30 }
  0xe8   : > { %p3851_p0 = scmp.ne.s32.totalorder %s472_s30, %s3850_s1  ;;  %p3859_p9 = scmp.lt.s32.totalorder %s3850_s1, %s3850_s1 }
  0xea   : > { %p3853_p2 = pnand %p3851_p0, %p4392_p8  ;;  %p3860_p5 = por %p3859_p9, %p3858_p7 }
  0xec   : > { %p3854_p4 = pneg %p3853_p2 }
  0xee   : > { %p3861_p10 = pnand %p3860_p5, %p3854_p4 }
  0xf0   : > { %3864 = shalt.err (!%p3861_p10)
}
  0xf1   : > { %s5218_s29 = smov 128   ;;  %s5219_s6 = sld [smem:[#allocation53_spill]] }
  0xf2   : > { %3470 = dma.hbm_to_vmem [thread:$0]  (!%p4376_p6), %s5217_s4, 512, %s472_s30, [#allocation9], %s5218_s29, %s5218_s29, %s5190_s24  }
  0xf7   : > { %s3865_s28 = scalar_lea.hbm %s5219_s6, 512 }
  0xf8   : > { %p3866_p1 = scmp.ne.s32.totalorder %s5219_s6, %s3865_s28  ;;  %p3872_p12 = scmp.lt.u32.totalorder %s3865_s28, %s5219_s6 }
  0xfa   : > { %p3868_p3 = pnand %p3866_p1, %p4392_p8 }
  0xfc   : > { %p3869_p11 = pneg %p3868_p3 }
  0xfe   : > { %p3874_p13 = pnand %p3872_p12, %p3869_p11 }
 0x100   : > { %3877 = shalt.err (!%p3874_p13)
}
 0x101   : > { %s3878_s1 = scalar_lea.vmem %s496_s18, 512  ;;  %p3886_p7 = scmp.lt.s32.totalorder %s496_s18, %s496_s18 }
 0x102   : > { %p3879_p0 = scmp.ne.s32.totalorder %s496_s18, %s3878_s1  ;;  %p3887_p9 = scmp.lt.s32.totalorder %s3878_s1, %s3878_s1 }
 0x104   : > { %p3881_p2 = pnand %p3879_p0, %p4392_p8  ;;  %p3888_p5 = por %p3887_p9, %p3886_p7 }
 0x106   : > { %p3882_p4 = pneg %p3881_p2 }
 0x108   : > { %p3889_p10 = pnand %p3888_p5, %p3882_p4 }
 0x10a   : > { %3892 = shalt.err (!%p3889_p10)
}
 0x10b   : > { %3476 = dma.hbm_to_vmem [thread:$0]  (!%p4376_p6), %s5219_s6, 512, %s496_s18, [#allocation12], %s5218_s29, %s5218_s29, %s5190_s24  }
 0x10c   : > { %s4224_s21 = smov [#allocation16]   ;;  %s4225_s20 = smov [#allocation19]  }
 0x10d   : > { %s520_s22 = sshll.u32 %s4224_s21, 4  ;;  %s541_s28 = sshll.u32 %s4225_s20, 4  ;;  %s521_s22 = int_to_ptr.vmem [resolvable:$true] %s520_s22  ;;  %s542_s28 = int_to_ptr.vmem [resolvable:$true] %s541_s28 }
 0x10e   : > { %s5220_s8 = sld [smem:[#allocation55_spill]] }
 0x114   : > { %s3893_s16 = scalar_lea.hbm %s5220_s8, 16 }
 0x115   : > { %p3894_p1 = scmp.ne.s32.totalorder %s5220_s8, %s3893_s16  ;;  %p3900_p12 = scmp.lt.u32.totalorder %s3893_s16, %s5220_s8 }
 0x117   : > { %p3896_p3 = pnand %p3894_p1, %p4392_p8 }
 0x119   : > { %p3897_p11 = pneg %p3896_p3 }
 0x11b   : > { %p3902_p13 = pnand %p3900_p12, %p3897_p11 }
 0x11d   : > { %3905 = shalt.err (!%p3902_p13)
}
 0x11e   : > { %s3906_s18 = scalar_lea.vmem %s521_s22, 16  ;;  %s3913_s19 = scalar_lea.vmem %s521_s22, 32 }
 0x11f   : > { %p3907_p0 = scmp.ne.s32.totalorder %s521_s22, %s3906_s18  ;;  %p3914_p7 = scmp.lt.s32.totalorder %s521_s22, %s521_s22 }
 0x120   : > { %p3915_p9 = scmp.lt.s32.totalorder %s3913_s19, %s3906_s18 }
 0x121   : > { %p3909_p2 = pnand %p3907_p0, %p4392_p8 }
 0x122   : > { %p3916_p5 = por %p3915_p9, %p3914_p7 }
 0x123   : > { %p3910_p4 = pneg %p3909_p2 }
 0x125   : > { %p3917_p10 = pnand %p3916_p5, %p3910_p4 }
 0x127   : > { %3920 = shalt.err (!%p3917_p10)
}
 0x128   : > { %3482 = dma.hbm_to_vmem [thread:$0]  (!%p4376_p6), %s5220_s8, 16, %s521_s22, [#allocation15]  }
 0x129   : > { %s3921_s17 = scalar_lea.hbm %s5169_s10, 512 }
 0x12a   : > { %p3922_p1 = scmp.ne.s32.totalorder %s5169_s10, %s3921_s17  ;;  %p3928_p12 = scmp.lt.u32.totalorder %s3921_s17, %s5169_s10 }
 0x12c   : > { %p3924_p3 = pnand %p3922_p1, %p4392_p8 }
 0x12e   : > { %p3925_p11 = pneg %p3924_p3 }
 0x130   : > { %p3930_p13 = pnand %p3928_p12, %p3925_p11 }
 0x132   : > { %3933 = shalt.err (!%p3930_p13)
}
 0x133   : > { %s3934_s18 = scalar_lea.vmem %s542_s28, 512  ;;  %p3942_p7 = scmp.lt.s32.totalorder %s542_s28, %s542_s28 }
 0x134   : > { %p3935_p0 = scmp.ne.s32.totalorder %s542_s28, %s3934_s18  ;;  %p3943_p9 = scmp.lt.s32.totalorder %s3934_s18, %s3934_s18 }
 0x136   : > { %p3937_p2 = pnand %p3935_p0, %p4392_p8  ;;  %p3944_p5 = por %p3943_p9, %p3942_p7 }
 0x138   : > { %p3938_p4 = pneg %p3937_p2 }
 0x13a   : > { %p3945_p10 = pnand %p3944_p5, %p3938_p4 }
 0x13c   : > { %3948 = shalt.err (!%p3945_p10)
}
 0x13d   : > { %3488 = dma.hbm_to_vmem [thread:$0]  (!%p4376_p6), %s5169_s10, 512, %s542_s28, [#allocation18], %s5218_s29, %s5218_s29, %s5190_s24  }
 0x13e   : > { %s4226_s21 = smov [#allocation22]   ;;  %s4227_s2 = smov [#allocation25]  }
 0x13f   : > { %s565_s20 = sshll.u32 %s4226_s21, 4  ;;  %s590_s23 = sshll.u32 %s4227_s2, 4  ;;  %s566_s20 = int_to_ptr.vmem [resolvable:$true] %s565_s20  ;;  %s591_s23 = int_to_ptr.vmem [resolvable:$true] %s590_s23 }
 0x140   : > { %s3949_s25 = scalar_lea.hbm %s5171_s12, 1024 }
 0x141   : > { %p3950_p1 = scmp.ne.s32.totalorder %s5171_s12, %s3949_s25  ;;  %p3956_p12 = scmp.lt.u32.totalorder %s3949_s25, %s5171_s12 }
 0x143   : > { %p3952_p3 = pnand %p3950_p1, %p4392_p8 }
 0x145   : > { %p3953_p11 = pneg %p3952_p3 }
 0x147   : > { %p3958_p13 = pnand %p3956_p12, %p3953_p11 }
 0x149   : > { %3961 = shalt.err (!%p3958_p13)
}
 0x14a   : > { %s3962_s28 = scalar_lea.vmem %s566_s20, 1024  ;;  %p3970_p7 = scmp.lt.s32.totalorder %s566_s20, %s566_s20 }
 0x14b   : > { %p3963_p0 = scmp.ne.s32.totalorder %s566_s20, %s3962_s28  ;;  %p3971_p9 = scmp.lt.s32.totalorder %s3962_s28, %s3962_s28 }
 0x14d   : > { %p3965_p2 = pnand %p3963_p0, %p4392_p8  ;;  %p3972_p5 = por %p3971_p9, %p3970_p7 }
 0x14f   : > { %p3966_p4 = pneg %p3965_p2 }
 0x151   : > { %p3973_p10 = pnand %p3972_p5, %p3966_p4 }
 0x153   : > { %3976 = shalt.err (!%p3973_p10)
}
 0x154   : > { %3494 = dma.hbm_to_vmem [thread:$0]  (!%p4376_p6), %s5171_s12, 1024, %s566_s20, [#allocation21], %s5218_s29, %s5218_s29, %s5190_s24  }
 0x155   : > { %s3977_s16 = scalar_lea.hbm %s5173_s14, 16 }
 0x156   : > { %p3978_p1 = scmp.ne.s32.totalorder %s5173_s14, %s3977_s16  ;;  %p3984_p12 = scmp.lt.u32.totalorder %s3977_s16, %s5173_s14 }
 0x158   : > { %p3980_p3 = pnand %p3978_p1, %p4392_p8 }
 0x15a   : > { %p3981_p11 = pneg %p3980_p3 }
 0x15c   : > { %p3986_p13 = pnand %p3984_p12, %p3981_p11 }
 0x15e   : > { %3989 = shalt.err (!%p3986_p13)
}
 0x15f   : > { %s3990_s22 = scalar_lea.vmem %s591_s23, 16  ;;  %s3997_s20 = scalar_lea.vmem %s591_s23, 32 }
 0x160   : > { %p3991_p0 = scmp.ne.s32.totalorder %s591_s23, %s3990_s22  ;;  %p3998_p7 = scmp.lt.s32.totalorder %s591_s23, %s591_s23 }
 0x161   : > { %p3999_p9 = scmp.lt.s32.totalorder %s3997_s20, %s3990_s22 }
 0x162   : > { %p3993_p2 = pnand %p3991_p0, %p4392_p8 }
 0x163   : > { %p4000_p5 = por %p3999_p9, %p3998_p7 }
 0x164   : > { %p3994_p4 = pneg %p3993_p2 }
 0x166   : > { %p4001_p10 = pnand %p4000_p5, %p3994_p4 }
 0x168   : > { %4004 = shalt.err (!%p4001_p10)
}
 0x169   : > { %3500 = dma.hbm_to_vmem [thread:$0]  (!%p4376_p6), %s5173_s14, 16, %s591_s23, [#allocation24]  }
 0x16a   : > { %s4228_s21 = smov [#allocation26]   ;;  %s4005_s25 = scalar_lea.hbm %s5174_s15, 16 }
 0x16b   : > { %s601_s2 = sshll.u32 %s4228_s21, 4  ;;  %p4006_p1 = scmp.ne.s32.totalorder %s5174_s15, %s4005_s25  ;;  %s602_s2 = int_to_ptr.vmem [resolvable:$true] %s601_s2 }
 0x16c   : > { %p4012_p12 = scmp.lt.u32.totalorder %s4005_s25, %s5174_s15 }
 0x16d   : > { %p4008_p3 = pnand %p4006_p1, %p4392_p8 }
 0x16f   : > { %p4009_p11 = pneg %p4008_p3 }
 0x171   : > { %p4014_p13 = pnand %p4012_p12, %p4009_p11 }
 0x173   : > { %4017 = shalt.err (!%p4014_p13)
}
 0x174   : > { %s4018_s23 = scalar_lea.vmem %s602_s2, 16  ;;  %s4025_s20 = scalar_lea.vmem %s602_s2, 32 }
 0x175   : > { %p4019_p0 = scmp.ne.s32.totalorder %s602_s2, %s4018_s23  ;;  %p4026_p7 = scmp.lt.s32.totalorder %s602_s2, %s602_s2 }
 0x176   : > { %p4027_p9 = scmp.lt.s32.totalorder %s4025_s20, %s4018_s23 }
 0x177   : > { %p4021_p2 = pnand %p4019_p0, %p4392_p8 }
 0x178   : > { %p4028_p5 = por %p4027_p9, %p4026_p7 }
 0x179   : > { %p4022_p4 = pneg %p4021_p2 }
 0x17b   : > { %p4029_p10 = pnand %p4028_p5, %p4022_p4 }
 0x17d   : > { %4032 = shalt.err (!%p4029_p10)
}
 0x17e   : > { %s5221_s21 = sld [smem:[#allocation44_spill]]  ;;  %s5222_s17 = sld [smem:[#allocation42_spill]] }
 0x17f   : > { %s5223_s16 = sld [smem:[#allocation41_spill]]  ;;  %s5224_s27 = sld [smem:[#allocation40_spill]] }
 0x180   : > { %s5225_s25 = sld [smem:[#allocation45_spill]]  ;;  %s3072_s1 = sadd.s32 4294967294, %s4211_s26  }
 0x181   : > { %3503 = dma.hbm_to_vmem [thread:$0]  (!%p4376_p6), %s5174_s15, 16, %s602_s2, [#allocation27]  }
 0x182   : > { %p71_p3 = scmp.eq.s32.totalorder %s4211_s26, 0  ;;  %p428_p7 = scmp.eq.s32.totalorder %s3072_s1, 1 }
 0x183   : > { %p3529_p5 = scmp.lt.s32.totalorder %s4211_s26, 2  ;;  %s5231_s24 = sld [smem:[#allocation47_spill]] }
 0x184   : > { %s54_s30 = sadd.s32 1, %s5221_s21  ;;  %s63_s0 = sadd.s32 1, %s5222_s17 }
 0x185   : > { %p56_p8 = scmp.ge.s32.totalorder %s54_s30, 2  ;;  %p70_p1 = scmp.ne.s32.totalorder %s5222_s17, %s5223_s16 }
 0x186   : > { %p76_p12 = scmp.ne.s32.totalorder %s5223_s16, %s5224_s27  ;;  %p422_p6 = scmp.eq.s32.totalorder %s5225_s25, 1 }
 0x187   : > { %s5270_s30 = smov (%p56_p8, %s54_s30), 0  ;;  %p4677_p11 = por %p71_p3, %p70_p1 }
 0x188   : > { %s58_s2 = ssub.s32 %s5221_s21, %s5270_s30  ;;  %p5227_p0 = scmp.eq.s32.totalorder %s5225_s25, 0 }
 0x189   : > { %p61_p13 = scmp.eq.s32.totalorder %s58_s2, 0  ;;  %p4692_p4 = por %p422_p6, %p70_p1 }
 0x18a   : > { %p4688_p2 = por %p5227_p0, %p76_p12  ;;  %p4699_p9 = por %p428_p7, %p76_p12 }
 0x18b   : > { %s5229_s23 = scalar_select %p4692_p4, 1, 0 }
 0x18c   : > { %s4697_s20 = scalar_select %p61_p13, %s5222_s17, %s63_s0  }
 0x18d   : > { %s5230_s28 = scalar_select %p4699_p9, 1, 0 }
 0x18e   : > { %s4705_s19 = sand.u32 1, %s5222_s17   ;;  %s3090_s16 = sshll.u32 %s5221_s21, 7 }
 0x18f   : > { %s3089_s27 = sshll.u32 %s4705_s19, 3  ;;  %s5232_s3 = smov %s5231_s24 }
 0x190   : > { %s4712_s4 = scalar_lea.hbm %s5231_s24, %s3090_s16  ;;  %s616_s1 = scalar_lea.vmem [#allocation2], %s3089_s27 }
 0x191   : > { %s624_s0 = sshll.u32 %s616_s1, 4  ;;  %p4716_p10 = pnand %p3529_p5, %p4677_p11  ;;  %s4720_s0 = int_to_ptr.vmem [resolvable:$true] %s624_s0 }
 0x192   : > { %s3091_s5 = sshll.u32 %s4705_s19, 4  ;;  %s613_s6 = scalar_lea.sflag [#allocation3], %s4705_s19 }
 0x193   : > { %s4033_s25 = scalar_lea.hbm %s4712_s4, 128  ;;  %p4035_p1 = pneg %p4716_p10 }
 0x194   : > { %p4034_p8 = scmp.ne.s32.totalorder %s4712_s4, %s4033_s25  ;;  %s4038_s16 = scalar_lea.hbm %s5232_s3, 256 }
 0x195   : > { %p4039_p11 = scmp.lt.u32.totalorder %s4712_s4, %s5232_s3  ;;  %p4040_p6 = scmp.lt.u32.totalorder %s4038_s16, %s4033_s25 }
 0x196   : > { %p4036_p3 = pnand %p4035_p1, %p4034_p8  ;;  %p4042_p0 = scmp.lt.u32.totalorder %s4033_s25, %s4712_s4 }
 0x197   : > { %p4041_p13 = por %p4040_p6, %p4039_p11 }
 0x198   : > { %p4037_p12 = pneg %p4036_p3 }
 0x199   : > { %p4043_p7 = por %p4042_p0, %p4041_p13 }
 0x19b   : > { %p4044_p5 = pnand %p4043_p7, %p4037_p12 }
 0x19d   : > { %4047 = shalt.err (!%p4044_p5)
}
 0x19e   : > { %s4048_s1 = scalar_lea.vmem %s4720_s0, 128  ;;  %s4229_s24 = smov [#allocation2]  }
 0x19f   : > { %p4049_p8 = scmp.ne.s32.totalorder %s4720_s0, %s4048_s1  ;;  %s4053_s18 = sshll.u32 %s4229_s24, 4  ;;  %s4054_s18 = int_to_ptr.vmem [resolvable:$false] %s4053_s18 }
 0x1a0   : > { %s4055_s27 = scalar_lea.vmem %s4054_s18, 256  ;;  %p4056_p4 = scmp.lt.s32.totalorder %s4720_s0, %s4054_s18 }
 0x1a1   : > { %p4051_p3 = pnand %p4049_p8, %p4035_p1  ;;  %p4057_p11 = scmp.lt.s32.totalorder %s4055_s27, %s4048_s1 }
 0x1a3   : > { %p4052_p9 = pneg %p4051_p3  ;;  %p4058_p6 = por %p4057_p11, %p4056_p4 }
 0x1a5   : > { %p4059_p13 = pnand %p4058_p6, %p4052_p9 }
 0x1a7   : > { %4062 = shalt.err (!%p4059_p13)
}
 0x1a8   : > { %3507 = dma.hbm_to_vmem [thread:$0]  (!%p4716_p10), %s4712_s4, 128, %s4720_s0, %s613_s6  }
 0x1a9   : > { %s3159_s25 = sshll.u32 %s5221_s21, 8  ;;  %s635_s16 = scalar_lea.vmem [#allocation5], %s3091_s5 }
 0x1aa   : > { %s642_s2 = sshll.u32 %s635_s16, 4  ;;  %s631_s24 = sand.u32 1, %s4211_s26   ;;  %s4752_s2 = int_to_ptr.vmem [resolvable:$true] %s642_s2 }
 0x1ab   : > { %s5234_s27 = sld [smem:[#allocation48_spill]]  ;;  %s4760_s7 = scalar_lea.sflag [#allocation6], %s631_s24 }
 0x1b1   : > { %s4758_s3 = scalar_lea.hbm %s5234_s27, %s3159_s25  ;;  %s4068_s6 = scalar_lea.hbm %s5234_s27, 512 }
 0x1b2   : > { %s4063_s8 = scalar_lea.hbm %s4758_s3, 256  ;;  %p4069_p0 = scmp.lt.u32.totalorder %s4758_s3, %s5234_s27 }
 0x1b3   : > { %p4064_p4 = scmp.ne.s32.totalorder %s4758_s3, %s4063_s8  ;;  %p4070_p7 = scmp.lt.u32.totalorder %s4068_s6, %s4063_s8 }
 0x1b4   : > { %p4072_p8 = scmp.lt.u32.totalorder %s4063_s8, %s4758_s3 }
 0x1b5   : > { %p4066_p9 = pnand %p4064_p4, %p4035_p1  ;;  %p4071_p5 = por %p4070_p7, %p4069_p0 }
 0x1b7   : > { %p4067_p12 = pneg %p4066_p9  ;;  %p4073_p3 = por %p4072_p8, %p4071_p5 }
 0x1b9   : > { %p4074_p11 = pnand %p4073_p3, %p4067_p12 }
 0x1bb   : > { %4077 = shalt.err (!%p4074_p11)
}
 0x1bc   : > { %s4078_s0 = scalar_lea.vmem %s4752_s2, 256  ;;  %s4230_s25 = smov [#allocation5]  }
 0x1bd   : > { %p4079_p6 = scmp.ne.s32.totalorder %s4752_s2, %s4078_s0  ;;  %s4083_s16 = sshll.u32 %s4230_s25, 4  ;;  %s4084_s16 = int_to_ptr.vmem [resolvable:$false] %s4083_s16 }
 0x1be   : > { %s4085_s24 = scalar_lea.vmem %s4084_s16, 512  ;;  %p4086_p9 = scmp.lt.s32.totalorder %s4752_s2, %s4084_s16 }
 0x1bf   : > { %p4081_p13 = pnand %p4079_p6, %p4035_p1  ;;  %p4087_p0 = scmp.lt.s32.totalorder %s4085_s24, %s4078_s0 }
 0x1c1   : > { %p4082_p4 = pneg %p4081_p13  ;;  %p4088_p7 = por %p4087_p0, %p4086_p9 }
 0x1c3   : > { %p4089_p5 = pnand %p4088_p7, %p4082_p4 }
 0x1c5   : > { %4092 = shalt.err (!%p4089_p5)
}
 0x1c6   : > { %s5235_s8 = smov 8   ;;  %s5236_s1 = sld [smem:[#allocation46_spill]] }
 0x1c7   : > { %3510 = dma.hbm_to_vmem [thread:$0]  (!%p4716_p10), %s4758_s3, 256, %s4752_s2, %s4760_s7, %s5218_s29, %s5218_s29, %s5235_s8  }
 0x1cc   : > { %p5237_p1 = scmp.ne.s32.totalorder %s5236_s1, 0 }
 0x1cd   : > { %s5238_s18 = sld [smem:[#allocation41_spill]] (!%p5237_p1) }
 0x1ce   : > { %654 = sbr.rel (%p5237_p1) target bundleno = 3067 (0xbfb), region = 84 }
 0x1d3   : > { %s4792_s4 = sand.u32 (!%p5237_p1), 1, %s5238_s18  }
 0x1d4   : > { %s3095_s5 = sshll.u32 (!%p5237_p1), %s4792_s4, 3  ;;  %s657_s6 = scalar_lea.sflag (!%p5237_p1), [#allocation3], %s4792_s4 }
 0x1d5   : > { %s4798_s17 = scalar_lea.vmem [#allocation2], %s3095_s5 }
 0x1d6   : > { %4146 = dma.done.wait (%p4688_p2), %s657_s6, 128  }
 0x1d7   : > { %4148 = vsyncadd (%p4688_p2), %s657_s6, 4294967168  ;;  %s5239_s3 = sld [smem:[#allocation45_spill]]  ;;  %s3096_s29 = sshll.u32 %s4792_s4, 4 }
 0x1d8   : > { %s4806_s21 = scalar_lea.vmem [#allocation5], %s3096_s29 }
 0x1dd   : > { %s665_s7 = sand.u32 1, %s5239_s3  }
 0x1de   : > { %s666_s2 = scalar_lea.sflag [#allocation6], %s665_s7 }
 0x1df   : > { %4150 = dma.done.wait (%p4688_p2), %s666_s2, 256  }
 0x1e0   : > { %4152 = vsyncadd (%p4688_p2), %s666_s2, 4294967040  ;;  %p5240_p10 = scmp.eq.s32.totalorder %s5239_s3, 0 }
 0x1e2   : > { %4154 = dma.done.wait (%p5240_p10), [#allocation6], 512   ;;  %p5241_p12 = pmov %p5240_p10 }
 0x1e3   : > { %p5242_p8 = pmov %p5240_p10 }
 0x1e4   : > { %4156 = vsyncadd (%p5241_p12), [#allocation6], 4294966784 }
 0x1e5   : > { %4158 = dma.done.wait (%p5242_p8), [#allocation9], 528   ;;  %p5243_p3 = pmov %p5242_p8 }
 0x1e7   : > { %4160 = vsyncadd (%p5243_p3), [#allocation9], 4294966768  ;;  %p5244_p11 = pmov %p5243_p3 }
 0x1e8   : > { %p5245_p6 = pmov %p5243_p3 }
 0x1e9   : > { %4162 = dma.done.wait (%p5244_p11), [#allocation12], 528  }
 0x1ea   : > { %4164 = vsyncadd (%p5245_p6), [#allocation12], 4294966768  ;;  %p5246_p2 = pmov %p5243_p3 }
 0x1ec   : > { %4166 = dma.done.wait (%p5246_p2), [#allocation15], 32   ;;  %p5247_p13 = pmov %p5246_p2 }
 0x1ed   : > { %p5248_p4 = pmov %p5246_p2 }
 0x1ee   : > { %4168 = vsyncadd (%p5247_p13), [#allocation15], 4294967264 }
 0x1ef   : > { %4170 = dma.done.wait (%p5248_p4), [#allocation18], 528   ;;  %p5249_p9 = pmov %p5246_p2 }
 0x1f0   : > { %p5250_p0 = pmov %p5246_p2 }
 0x1f1   : > { %4172 = vsyncadd (%p5249_p9), [#allocation18], 4294966768 }
 0x1f2   : > { %4174 = dma.done.wait (%p5250_p0), [#allocation21], 1040   ;;  %p5251_p7 = pmov %p5250_p0 }
 0x1f3   : > { %p5252_p5 = pmov %p5250_p0 }
 0x1f4   : > { %4176 = vsyncadd (%p5251_p7), [#allocation21], 4294966256 }
 0x1f5   : > { %4178 = dma.done.wait (%p5252_p5), [#allocation24], 32   ;;  %p5253_p1 = pmov %p5250_p0 }
 0x1f6   : > { %p5254_p10 = pmov %p5250_p0 }
 0x1f7   : > { %4180 = vsyncadd (%p5253_p1), [#allocation24], 4294967264 }
 0x1f8   : > { %4182 = dma.done.wait (%p5254_p10), [#allocation27], 16   ;;  %p5255_p12 = pmov %p5250_p0 }
 0x1f9   : > { %v4231_v0 = vmov 0.0|0.0   ;;  %vm4232_vm0 = vmmov 0   ;;  %v4233_v1 = vmov 0.0   ;;  %v782_v2 = vld [vmem:[#allocation7] sm:$0xff]  ;;  %v783_v3 = vld [vmem:[#allocation7 + $0x8] sm:$0xff]  ;;  %v784_v4 = vld [vmem:[#allocation7 + $0x10] sm:$0xff]  ;;  %v975_v29 = vlaneseq }
 0x1fa   : > { %4184 = vsyncadd (%p5255_p12), [#allocation27], 4294967280  ;;  %3333 = vmatprep.subr.bf16.mxu1 %v4231_v0  ;;  %3222 = vmatprep.mubr.msk.f32.mxu1 %vm4232_vm0, %v4233_v1  ;;  %v3334_v5 = vpack.c.bf16 %v783_v3, %v782_v2  ;;  %v785_v6 = vld [vmem:[#allocation7 + $0x18] sm:$0xff]  ;;  %v868_v7 = vld [vmem:[#allocation10] sm:$0xff]  ;;  %vm793_vm1 = vcmask 261120   ;;  %s4234_s22 = smov 112  }
 0x1fb   : > { %3347 = vmatprep.subr.bf16.mxu0 %v4231_v0  ;;  %3240 = vmatprep.mubr.msk.f32.mxu0 %vm4232_vm0, %v4233_v1  ;;  %v869_v8 = vld [vmem:[#allocation10 + $0x8] sm:$0xff]  ;;  %v3337_v9 = vpack.c.bf16 %v785_v6, %v784_v4  ;;  %v870_v11 = vld [vmem:[#allocation10 + $0x10] sm:$0xff]  ;;  %v871_v12 = vld [vmem:[#allocation10 + $0x18] sm:$0xff]  ;;  %s4235_s19 = smov 120   ;;  %s4236_s0 = smov 104   ;;  %v976_v33 = vshrl.u32 %v975_v29, 7 }
 0x1fc   : > { %3335 = vmatpush3.bf16.msra.mxu1 %v3334_v5  ;;  %v3339_v10 = vpack.c.bf16 %v869_v8, %v868_v7  ;;  %v4852_v13 = vld [vmem:[%s4798_s17] sm:$0xff]  ;;  %v3343_v14 = vpack.c.bf16 %v871_v12, %v870_v11  ;;  %v780_v15 = vld [vmem:[%s4806_s21] sm:$0xff]  ;;  %v4237_v27 = vmov 1983009808   ;;  %v4238_v34 = vmov 1934713408  }
 0x1fd   : > { %3336 = vmatprep.subr.bf16.mxu1 %v4231_v0  ;;  %v781_v16 = vld [vmem:[%s4806_s21 + $0x8] sm:$0xff]  ;;  %v3114_v19 = vld [vmem:[#allocation11] ss:$0 sm:$0xff]  ;;  %v3112_v24 = vld [vmem:[#allocation8] ss:$0 sm:$0xff]  ;;  %v973_v28 = vunpack.c.l.s4 %v4237_v27  ;;  %v1005_v35 = vunpack.c.l.s4 %v4238_v34  ;;  %vm1694_vm2 = vcmask 64512  }
 0x1fe   : > { %vm4954_vm3 = vmpackc.low %vm1694_vm2, %vm1694_vm2  ;;  %vm2011_vm4 = vcmask 130048   ;;  %s4239_s25 = smov 96   ;;  %s4240_s16 = smov 16   ;;  %vm2498_vm5 = vcmask 195584   ;;  %vm2715_vm6 = vcmask 523264  }
 0x1ff   : > { %v974_v32 = vunpack.c.0.s8 %v973_v28  ;;  %v1006_v41 = vunpack.c.0.s8 %v1005_v35  ;;  %s4241_s24 = smov 8   ;;  %s4242_s8 = smov 24  }
 0x200   : > { %3338 = vmatpush3.bf16.msra.mxu1 %v3337_v9  ;;  %s5258_s1 = sld [smem:[#allocation43_spill]]  ;;  %s778_s6 = scalar_lea.vmem [#allocation28], %s3095_s5 }
 0x201   : > { %3340 = vmatprep.subr.bf16.mxu1 %v3339_v10  ;;  %v4886_v38 = vsub.s32 %v974_v32, %v976_v33  ;;  %v4910_v52 = vsub.s32 %v1006_v41, %v976_v33  ;;  %s2835_s17 = sshll.u32 %s778_s6, 4  ;;  %s5259_s29 = sld [smem:[#allocation56_spill]]  ;;  %s5111_s17 = int_to_ptr.vmem [resolvable:$true] %s2835_s17 }
 0x202   : > { %s2821_s21 = scalar_lea.sflag [#allocation4], %s4792_s4  ;;  %p5260_p3 = scmp.ne.s32.totalorder %s5229_s23, 0 }
 0x203   : > { %3223 = vmatmul.mubr.msk.f32.vlgmr.msra.gmra.mrb[0].mxu1 %vm793_vm1, %v4852_v13  ;;  %s4243_s5 = smov [#allocation28]  }
 0x204   : > { %3342 = vmatpush3.bf16.msra.mxu1 %v3339_v10  ;;  %3233 = vmatprep.mubr.msk.f32.mxu1 %vm793_vm1, %v780_v15 }
 0x205   : > { %3344 = vmatprep.subr.bf16.mxu1 %v3343_v14 }
 0x206   : > { %s3156_s18 = sshll.u32 %s5258_s1, 7 }
 0x207   : > { %s5109_s2 = scalar_lea.hbm %s5259_s29, %s3156_s18 }
 0x208   : > { %3346 = vmatpush3.bf16.msra.mxu1 %v3343_v14 }
 0x209   : > { %3351 = vmatprep.subr.bf16.mxu1 %v4231_v0 }
 0x20b   : > { %3234 = vmatmul.mubr.msk.f32.vlgmr.msra.gmra.mrb[2].mxu1 %vm793_vm1, %v781_v16 }
 0x20c   : > { %3247 = vmatprep.mubr.msk.f32.mxu1 %vm4232_vm0, %v4233_v1 }
 0x2d6   : > { %v863_v17 = vpop.f32.mrb[0].mxu1 }
 0x2d7   : > { %v3224_v18 = vpop.f32.mrb[1].mxu1  ;;  %v864_v25 = vadd.f32 %v3112_v24, %v863_v17 }
 0x2d9   : > { %v4873_v26 = vmul.f32 0.35355338, %v864_v25 }
 0x2de   : > { %v3235_v20 = vpop.f32.mrb[2].mxu1 }
 0x2df   : > { %v4863_v21 = vadd.f32 %v3235_v20, %v3114_v19  ;;  %v951_v22 = vpop.f32.mrb[3].mxu1 }
 0x2e0   : > { %v4867_v23 = vadd.f32 %v3114_v19, %v951_v22 }
 0x2e1   : > { %1116 = vrot.lane.b32.xlu1 %v4863_v21, %s4234_s22  ;;  %1110 = vrot.lane.b32.xlu0 %v4863_v21, %s4235_s19 }
 0x2e5   : > { %1114 = vrot.lane.b32.xlu1 %v4867_v23, %s4234_s22  ;;  %1108 = vrot.lane.b32.xlu0 %v4867_v23, %s4235_s19 }
 0x2e9   : > { %1122 = vrot.lane.b32.xlu1 %v4863_v21, %s4236_s0  ;;  %1120 = vrot.lane.b32.xlu0 %v4867_v23, %s4236_s0 }
 0x2ed   : > { %964 = vrot.lane.b32.xlu1 %v4873_v26, %s4234_s22  ;;  %961 = vrot.lane.b32.xlu0 %v4873_v26, %s4235_s19  ;;  %s4093_s22 = scalar_lea.vmem %s5111_s17, 128  ;;  %s4097_s19 = sshll.u32 %s4243_s5, 4  ;;  %s4098_s19 = int_to_ptr.vmem [resolvable:$false] %s4097_s19 }
 0x2ee   : > { %p4094_p8 = scmp.ne.s32.totalorder %s5111_s17, %s4093_s22  ;;  %p4100_p2 = scmp.lt.s32.totalorder %s5111_s17, %s4098_s19 }
 0x2f0   : > { %p4095_p11 = pnand %p4094_p8, %p5260_p3 }
 0x2f1   : > { %967 = vrot.lane.b32.xlu0 %v4873_v26, %s4236_s0  ;;  %s4099_s0 = scalar_lea.vmem %s4098_s19, 256 }
 0x2f2   : > { %p4096_p6 = pneg %p4095_p11  ;;  %p4101_p13 = scmp.lt.s32.totalorder %s4099_s0, %s4093_s22 }
 0x2f4   : > { %p4102_p4 = por %p4101_p13, %p4100_p2 }
 0x2f6   : > { %p4103_p9 = pnand %p4102_p4, %p4096_p6 }
 0x353   : > { %v4878_v30 = vpop.permute.xlu1 %1116  ;;  %v4880_v31 = vpop.permute.xlu0 %1110 }
 0x354   : > { %v1194_v39 = vcombine.low %v4863_v21, %v4878_v30  ;;  %v1195_v40 = vcombine.high %v4863_v21, %v4878_v30 }
 0x356   : > { %v1202_v50 = vrot.slane %v1194_v39, %v4886_v38  ;;  %v1209_v51 = vrot.slane %v1195_v40, %v4886_v38 }
 0x357   : > { %v4882_v36 = vpop.permute.xlu1 %1114  ;;  %v4884_v37 = vpop.permute.xlu0 %1108 }
 0x358   : > { %v1126_v42 = vcombine.low %v4867_v23, %v4882_v36  ;;  %v1127_v43 = vcombine.high %v4867_v23, %v4882_v36 }
 0x35a   : > { %v1134_v57 = vrot.slane %v1126_v42, %v4886_v38  ;;  %v1141_v58 = vrot.slane %v1127_v43, %v4886_v38 }
 0x35b   : > { %v4896_v44 = vpop.permute.xlu1 %1122  ;;  %v4898_v45 = vpop.permute.xlu0 %1120 }
 0x35c   : > { %v1210_v46 = vcombine.low %v4880_v31, %v4896_v44  ;;  %v1211_v47 = vcombine.high %v4880_v31, %v4896_v44  ;;  %v1142_v48 = vcombine.low %v4884_v37, %v4898_v45  ;;  %v1143_v49 = vcombine.high %v4884_v37, %v4898_v45 }
 0x35e   : > { %v1218_v53 = vrot.slane %v1210_v46, %v4886_v38  ;;  %v1225_v54 = vrot.slane %v1211_v47, %v4886_v38  ;;  %v1150_v55 = vrot.slane %v1142_v48, %v4886_v38  ;;  %v1157_v56 = vrot.slane %v1143_v49, %v4886_v38 }
 0x35f   : > { %v962_v59 = vpop.permute.xlu0 %961  ;;  %v965_v12 = vpop.permute.xlu1 %964 }
 0x360   : > { %v1226_v60 = vcombine.low %v1202_v50, %v1218_v53  ;;  %v1227_v61 = vcombine.high %v1202_v50, %v1218_v53  ;;  %v1242_v62 = vcombine.low %v1209_v51, %v1225_v54  ;;  %v1243_v63 = vcombine.high %v1209_v51, %v1225_v54 }
 0x361   : > { %v1158_v2 = vcombine.low %v1134_v57, %v1150_v55  ;;  %v1159_v3 = vcombine.high %v1134_v57, %v1150_v55  ;;  %v1174_v4 = vcombine.low %v1141_v58, %v1157_v56  ;;  %v1175_v5 = vcombine.high %v1141_v58, %v1157_v56 }
 0x362   : > { %v1234_v6 = vrot.slane %v1226_v60, %v4910_v52  ;;  %v1241_v7 = vrot.slane %v1227_v61, %v4910_v52  ;;  %v1250_v15 = vrot.slane %v1242_v62, %v4910_v52  ;;  %v1257_v16 = vrot.slane %v1243_v63, %v4910_v52 }
 0x363   : > { %v1166_v8 = vrot.slane %v1158_v2, %v4910_v52  ;;  %v1173_v9 = vrot.slane %v1159_v3, %v4910_v52  ;;  %v1182_v10 = vrot.slane %v1174_v4, %v4910_v52  ;;  %v1189_v11 = vrot.slane %v1175_v5, %v4910_v52  ;;  %v968_v14 = vpop.permute.xlu0 %967 }
 0x364   : > { %v1330_v17 = vcombine.low %v1234_v6, %v1241_v7  ;;  %v3121_v18 = vcombine.high %v1234_v6, %v1241_v7  ;;  %v970_v25 = vcombine.low %v4873_v26, %v965_v12  ;;  %v971_v27 = vcombine.high %v4873_v26, %v965_v12 }
 0x365   : > { %v1262_v19 = vcombine.low %v1166_v8, %v1173_v9  ;;  %v3119_v20 = vcombine.high %v1166_v8, %v1173_v9  ;;  %v1278_v22 = vcombine.low %v1182_v10, %v1189_v11  ;;  %v3120_v24 = vcombine.high %v1182_v10, %v1189_v11 }
 0x366   : > { %v986_v28 = vcombine.low %v962_v59, %v968_v14  ;;  %v987_v29 = vcombine.high %v962_v59, %v968_v14  ;;  %v978_v39 = vrot.slane %v970_v25, %v4886_v38  ;;  %v985_v40 = vrot.slane %v971_v27, %v4886_v38 }
 0x367   : > { %v1269_v32 = vrot.slane %v1262_v19, %v4886_v38  ;;  %v1277_v33 = vrot.slane %v3119_v20, %v4886_v38  ;;  %v1285_v34 = vrot.slane %v1278_v22, %v4886_v38  ;;  %v1293_v35 = vrot.slane %v3120_v24, %v4886_v38 }
 0x368   : > { %v994_v41 = vrot.slane %v986_v28, %v4886_v38  ;;  %v1001_v42 = vrot.slane %v987_v29, %v4886_v38  ;;  %v1346_v43 = vcombine.low %v1250_v15, %v1257_v16  ;;  %v3122_v26 = vcombine.high %v1250_v15, %v1257_v16 }
 0x369   : > { %v1294_v46 = vcombine.low %v1269_v32, %v1277_v33  ;;  %v1310_v47 = vcombine.low %v1285_v34, %v1293_v35  ;;  %v1337_v55 = vrot.slane %v1330_v17, %v4886_v38  ;;  %v1345_v56 = vrot.slane %v3121_v18, %v4886_v38 }
 0x36a   : > { %v1002_v48 = vcombine.low %v978_v39, %v994_v41  ;;  %v1003_v49 = vcombine.high %v978_v39, %v994_v41  ;;  %v1018_v50 = vcombine.low %v985_v40, %v1001_v42  ;;  %v1019_v51 = vcombine.high %v985_v40, %v1001_v42 }
 0x36b   : > { %v1302_v53 = vrot.slane %v1294_v46, %v4910_v52  ;;  %v1318_v54 = vrot.slane %v1310_v47, %v4910_v52  ;;  %v1295_v61 = vcombine.high %v1269_v32, %v1277_v33  ;;  %v1311_v62 = vcombine.high %v1285_v34, %v1293_v35 }
 0x36c   : > { %v1010_v57 = vrot.slane %v1002_v48, %v4910_v52  ;;  %v1017_v58 = vrot.slane %v1003_v49, %v4910_v52  ;;  %v1026_v59 = vrot.slane %v1018_v50, %v4910_v52  ;;  %v1033_v60 = vrot.slane %v1019_v51, %v4910_v52 }
 0x36d   : > { %v1353_v63 = vrot.slane %v1346_v43, %v4886_v38  ;;  %v1361_v2 = vrot.slane %v3122_v26, %v4886_v38  ;;  %v1326_v7 = vcombine.low %v1302_v53, %v1318_v54  ;;  %v1327_v8 = vcombine.high %v1302_v53, %v1318_v54 }
 0x36e   : > { %v1038_v3 = vcombine.low %v1010_v57, %v1017_v58  ;;  %v3117_v4 = vcombine.high %v1010_v57, %v1017_v58  ;;  %v1054_v5 = vcombine.low %v1026_v59, %v1033_v60  ;;  %v3118_v6 = vcombine.high %v1026_v59, %v1033_v60 }
 0x36f   : > { %v1362_v9 = vcombine.low %v1337_v55, %v1345_v56  ;;  %v1378_v10 = vcombine.low %v1353_v63, %v1361_v2  ;;  %v1363_v16 = vcombine.high %v1337_v55, %v1345_v56  ;;  %v1379_v18 = vcombine.high %v1353_v63, %v1361_v2 }
 0x370   : > { %v1045_v11 = vrot.slane %v1038_v3, %v4886_v38  ;;  %v1053_v12 = vrot.slane %v3117_v4, %v4886_v38  ;;  %v1061_v14 = vrot.slane %v1054_v5, %v4886_v38  ;;  %v1069_v15 = vrot.slane %v3118_v6, %v4886_v38 }
 0x371   : > { %v1370_v17 = vrot.slane %v1362_v9, %v4910_v52  ;;  %v1386_v19 = vrot.slane %v1378_v10, %v4910_v52  ;;  %v1309_v28 = vrot.slane %v1295_v61, %v4910_v52  ;;  %v1325_v29 = vrot.slane %v1311_v62, %v4910_v52 }
 0x372   : > { %v1070_v20 = vcombine.low %v1045_v11, %v1053_v12  ;;  %v1086_v22 = vcombine.low %v1061_v14, %v1069_v15  ;;  %v1377_v34 = vrot.slane %v1363_v16, %v4910_v52  ;;  %v1393_v35 = vrot.slane %v1379_v18, %v4910_v52 }
 0x373   : > { %v1394_v24 = vcombine.low %v1370_v17, %v1386_v19  ;;  %v1395_v25 = vcombine.high %v1370_v17, %v1386_v19  ;;  %v1328_v41 = vcombine.low %v1309_v28, %v1325_v29  ;;  %v1329_v43 = vcombine.high %v1309_v28, %v1325_v29 }
 0x374   : > { %v1078_v39 = vrot.slane %v1070_v20, %v4910_v52  ;;  %v1094_v40 = vrot.slane %v1086_v22, %v4910_v52  ;;  %v1396_v42 = vcombine.low %v1377_v34, %v1393_v35  ;;  %v1397_v26 = vcombine.high %v1377_v34, %v1393_v35 }
 0x375   : > { %v3348_v32 = vpack.c.bf16 %v1394_v24, %v1326_v7  ;;  %v3352_v33 = vpack.c.bf16 %v1395_v25, %v1327_v8  ;;  %v1071_v48 = vcombine.high %v1045_v11, %v1053_v12  ;;  %v1087_v49 = vcombine.high %v1061_v14, %v1069_v15 }
 0x376   : > { %v1102_v46 = vcombine.low %v1078_v39, %v1094_v40  ;;  %v1103_v47 = vcombine.high %v1078_v39, %v1094_v40  ;;  %v3356_v50 = vpack.c.bf16 %v1396_v42, %v1328_v41  ;;  %v3360_v51 = vpack.c.bf16 %v1397_v26, %v1329_v43 }
 0x377   : > { %3350 = vmatpush3.bf16.xpose.msk.msra.mxu0 %vm4954_vm3, %v3348_v32  ;;  %3354 = vmatpush3.bf16.xpose.msk.msra.mxu1 %vm4954_vm3, %v3352_v33  ;;  %v1085_v53 = vrot.slane %v1071_v48, %v4910_v52  ;;  %v1101_v54 = vrot.slane %v1087_v49, %v4910_v52 }
 0x378   : > { %3355 = vmatprep.subr.bf16.mxu0 %v4231_v0  ;;  %3359 = vmatprep.subr.bf16.mxu1 %v4231_v0 }
 0x379   : > { %v1104_v55 = vcombine.low %v1085_v53, %v1101_v54  ;;  %v1105_v56 = vcombine.high %v1085_v53, %v1101_v54 }
 0x37e   : > { %3241 = vmatmul.mubr.msk.f32.vlgmr.msra.gmra.mrb[0].mxu0 %vm1694_vm2, %v1102_v46  ;;  %3248 = vmatmul.mubr.msk.f32.vlgmr.msra.gmra.mrb[4].mxu1 %vm1694_vm2, %v1103_v47 }
 0x37f   : > { %3358 = vmatpush3.bf16.xpose.msk.msra.mxu0 %vm4954_vm3, %v3356_v50  ;;  %3362 = vmatpush3.bf16.xpose.msk.msra.mxu1 %vm4954_vm3, %v3360_v51 }
 0x380   : > { %3254 = vmatprep.mubr.msk.f32.mxu0 %vm4232_vm0, %v4233_v1  ;;  %3261 = vmatprep.mubr.msk.f32.mxu1 %vm4232_vm0, %v4233_v1 }
 0x381   : > { %3363 = vmatprep.subr.bf16.mxu0 %v4231_v0  ;;  %3366 = vmatprep.subr.bf16.mxu1 %v4231_v0 }
 0x386   : > { %3255 = vmatmul.mubr.msk.f32.vlgmr.msra.gmra.mrb[2].mxu0 %vm1694_vm2, %v1104_v55  ;;  %3262 = vmatmul.mubr.msk.f32.vlgmr.msra.gmra.mrb[6].mxu1 %vm1694_vm2, %v1105_v56 }
 0x387   : > { %3268 = vmatprep.mubr.msk.f32.mxu0 %vm4232_vm0, %v4233_v1  ;;  %3275 = vmatprep.mubr.msk.f32.mxu1 %vm4232_vm0, %v4233_v1 }
 0x451   : > { %v1770_v57 = vpop.f32.mrb[0].mxu0  ;;  %v1849_v58 = vpop.f32.mrb[4].mxu1 }
 0x452   : > { %v3242_v59 = vpop.f32.mrb[1].mxu0  ;;  %v3249_v60 = vpop.f32.mrb[5].mxu1  ;;  %v2015_v61 = vsel %vm2011_vm4, %v1849_v58, -inf  ;;  %v2012_v62 = vsel %vm2011_vm4, %v1770_v57, -inf }
 0x453   : > { %2016 = vmax.xlane.f32.xlu0 %v2015_v61  ;;  %2013 = vmax.xlane.f32.xlu1 %v2012_v62 }
 0x459   : > { %v1928_v63 = vpop.f32.mrb[2].mxu0  ;;  %v2007_v2 = vpop.f32.mrb[6].mxu1 }
 0x45a   : > { %v3256_v3 = vpop.f32.mrb[3].mxu0  ;;  %v3263_v4 = vpop.f32.mrb[7].mxu1  ;;  %v2021_v5 = vsel %vm2011_vm4, %v2007_v2, -inf  ;;  %v2018_v6 = vsel %vm2011_vm4, %v1928_v63, -inf }
 0x45b   : > { %2022 = vmax.xlane.f32.xlu1 %v2021_v5  ;;  %2019 = vmax.xlane.f32.xlu0 %v2018_v6 }
 0x46c   : > { %1400 = vrot.lane.b32.xlu1 %v4863_v21, %s4239_s25 }
 0x470   : > { %1402 = vrot.lane.b32.xlu1 %v4884_v37, %s4239_s25 }
 0x471   : > { %1398 = vrot.lane.b32.xlu0 %v4867_v23, %s4239_s25 }
 0x474   : > { %1406 = vrot.lane.b32.xlu1 %v4882_v36, %s4239_s25 }
 0x475   : > { %1404 = vrot.lane.b32.xlu0 %v4880_v31, %s4239_s25 }
 0x478   : > { %1410 = vrot.lane.b32.xlu1 %v4898_v45, %s4239_s25 }
 0x479   : > { %1408 = vrot.lane.b32.xlu0 %v4878_v30, %s4239_s25 }
 0x47d   : > { %1412 = vrot.lane.b32.xlu0 %v4896_v44, %s4239_s25 }
 0x4e0   : > { %v2017_v7 = vpop.xlane.xlu0 %2016  ;;  %v2014_v8 = vpop.xlane.xlu1 %2013 }
 0x4e1   : > { %v2025_v9 = vsub.f32 %v1849_v58, %v2017_v7  ;;  %v2024_v10 = vsub.f32 %v1770_v57, %v2014_v8 }
 0x4e3   : > { %v2030_v11 = vmul.f32 1.442695, %v2025_v9  ;;  %v2028_v21 = vmul.f32 1.442695, %v2024_v10 }
 0x4e5   : > { %3621 = vpow2.f32 %v2030_v11 }
 0x4e6   : > { %3623 = vpow2.f32 %v2028_v21 }
 0x4e8   : > { %v2023_v37 = vpop.xlane.xlu1 %2022  ;;  %v2020_v23 = vpop.xlane.xlu0 %2019 }
 0x4e9   : > { %v2027_v12 = vsub.f32 %v2007_v2, %v2023_v37  ;;  %v2026_v36 = vsub.f32 %v1928_v63, %v2020_v23 }
 0x4eb   : > { %v2034_v14 = vmul.f32 1.442695, %v2027_v12  ;;  %v2032_v31 = vmul.f32 1.442695, %v2026_v36 }
 0x4ec   : > { %v1401_v15 = vpop.permute.xlu1 %1400  ;;  %v1399_v45 = vpop.permute.xlu0 %1398 }
 0x4ed   : > { %3625 = vpow2.f32 %v2034_v14 }
 0x4ee   : > { %3627 = vpow2.f32 %v2032_v31 }
 0x4ef   : > { %v5002_v30 = vpop.eup %3621 }
 0x4f0   : > { %v5004_v44 = vpop.eup %3623  ;;  %v1403_v16 = vpop.permute.xlu1 %1402  ;;  %v2039_v18 = vsel %vm2011_vm4, %v5002_v30, 0.0 }
 0x4f1   : > { %v1405_v17 = vpop.permute.xlu0 %1404  ;;  %2040 = vadd.xlane.f32.xlu1 %v2039_v18  ;;  %v2036_v19 = vsel %vm2011_vm4, %v5004_v44, 0.0 }
 0x4f2   : > { %2037 = vadd.xlane.f32.xlu0 %v2036_v19 }
 0x4f4   : > { %v1407_v20 = vpop.permute.xlu1 %1406 }
 0x4f5   : > { %v1409_v22 = vpop.permute.xlu0 %1408  ;;  %v1422_v24 = vcombine.low %v1399_v45, %v1407_v20  ;;  %v1423_v25 = vcombine.high %v1399_v45, %v1407_v20 }
 0x4f6   : > { %v1490_v29 = vcombine.low %v1401_v15, %v1409_v22  ;;  %v1491_v32 = vcombine.high %v1401_v15, %v1409_v22 }
 0x4f7   : > { %v5010_v27 = vpop.eup %3625  ;;  %v1430_v43 = vrot.slane %v1422_v24, %v4886_v38  ;;  %v1437_v26 = vrot.slane %v1423_v25, %v4886_v38 }
 0x4f8   : > { %v5012_v28 = vpop.eup %3627  ;;  %v1411_v33 = vpop.permute.xlu1 %1410  ;;  %v2045_v35 = vsel %vm2011_vm4, %v5010_v27, 0.0  ;;  %v1498_v51 = vrot.slane %v1490_v29, %v4886_v38  ;;  %v1505_v53 = vrot.slane %v1491_v32, %v4886_v38 }
 0x4f9   : > { %v1413_v34 = vpop.permute.xlu0 %1412  ;;  %v1438_v39 = vcombine.low %v1403_v16, %v1411_v33  ;;  %v1439_v40 = vcombine.high %v1403_v16, %v1411_v33  ;;  %2046 = vadd.xlane.f32.xlu0 %v2045_v35  ;;  %v2042_v46 = vsel %vm2011_vm4, %v5012_v28, 0.0 }
 0x4fa   : > { %v1506_v41 = vcombine.low %v1405_v17, %v1413_v34  ;;  %v1507_v42 = vcombine.high %v1405_v17, %v1413_v34  ;;  %2043 = vadd.xlane.f32.xlu1 %v2042_v46 }
 0x4fb   : > { %v1446_v47 = vrot.slane %v1438_v39, %v4886_v38  ;;  %v1453_v48 = vrot.slane %v1439_v40, %v4886_v38 }
 0x4fc   : > { %v1514_v49 = vrot.slane %v1506_v41, %v4886_v38  ;;  %v1521_v50 = vrot.slane %v1507_v42, %v4886_v38 }
 0x4fd   : > { %v1454_v54 = vcombine.low %v1430_v43, %v1446_v47  ;;  %v1455_v55 = vcombine.high %v1430_v43, %v1446_v47  ;;  %v1470_v56 = vcombine.low %v1437_v26, %v1453_v48  ;;  %v1471_v57 = vcombine.high %v1437_v26, %v1453_v48 }
 0x4fe   : > { %v1522_v58 = vcombine.low %v1498_v51, %v1514_v49  ;;  %v1523_v59 = vcombine.high %v1498_v51, %v1514_v49  ;;  %v1538_v60 = vcombine.low %v1505_v53, %v1521_v50  ;;  %v1539_v61 = vcombine.high %v1505_v53, %v1521_v50 }
 0x4ff   : > { %v1462_v62 = vrot.slane %v1454_v54, %v4910_v52  ;;  %v1469_v63 = vrot.slane %v1455_v55, %v4910_v52  ;;  %v1478_v2 = vrot.slane %v1470_v56, %v4910_v52  ;;  %v1485_v3 = vrot.slane %v1471_v57, %v4910_v52 }
 0x500   : > { %v1530_v4 = vrot.slane %v1522_v58, %v4910_v52  ;;  %v1537_v5 = vrot.slane %v1523_v59, %v4910_v52  ;;  %v1546_v6 = vrot.slane %v1538_v60, %v4910_v52  ;;  %v1553_v7 = vrot.slane %v1539_v61, %v4910_v52 }
 0x501   : > { %v1558_v8 = vcombine.low %v1462_v62, %v1469_v63  ;;  %v3123_v9 = vcombine.high %v1462_v62, %v1469_v63  ;;  %v1574_v10 = vcombine.low %v1478_v2, %v1485_v3  ;;  %v3124_v11 = vcombine.high %v1478_v2, %v1485_v3 }
 0x502   : > { %v1626_v21 = vcombine.low %v1530_v4, %v1537_v5  ;;  %v3125_v37 = vcombine.high %v1530_v4, %v1537_v5  ;;  %v1642_v23 = vcombine.low %v1546_v6, %v1553_v7  ;;  %v3126_v12 = vcombine.high %v1546_v6, %v1553_v7  ;;  %v2500_v7 = vld [vmem:[#allocation13] sm:$0xff] }
 0x503   : > { %v1565_v36 = vrot.slane %v1558_v8, %v4886_v38  ;;  %v1573_v14 = vrot.slane %v3123_v9, %v4886_v38  ;;  %v1581_v31 = vrot.slane %v1574_v10, %v4886_v38  ;;  %v1589_v15 = vrot.slane %v3124_v11, %v4886_v38  ;;  %v2501_v8 = vld [vmem:[#allocation13 + $0x8] sm:$0xff] }
 0x504   : > { %v1633_v45 = vrot.slane %v1626_v21, %v4886_v38  ;;  %v1641_v16 = vrot.slane %v3125_v37, %v4886_v38  ;;  %v1649_v17 = vrot.slane %v1642_v23, %v4886_v38  ;;  %v1657_v18 = vrot.slane %v3126_v12, %v4886_v38 }
 0x505   : > { %v1590_v19 = vcombine.low %v1565_v36, %v1573_v14  ;;  %v1606_v20 = vcombine.low %v1581_v31, %v1589_v15  ;;  %v1591_v22 = vcombine.high %v1565_v36, %v1573_v14  ;;  %v1607_v24 = vcombine.high %v1581_v31, %v1589_v15 }
 0x506   : > { %v1658_v25 = vcombine.low %v1633_v45, %v1641_v16  ;;  %v1674_v29 = vcombine.low %v1649_v17, %v1657_v18  ;;  %v1659_v32 = vcombine.high %v1633_v45, %v1641_v16  ;;  %v1675_v33 = vcombine.high %v1649_v17, %v1657_v18 }
 0x507   : > { %v1598_v34 = vrot.slane %v1590_v19, %v4910_v52  ;;  %v1614_v35 = vrot.slane %v1606_v20, %v4910_v52  ;;  %v1605_v39 = vrot.slane %v1591_v22, %v4910_v52  ;;  %v1621_v40 = vrot.slane %v1607_v24, %v4910_v52 }
 0x508   : > { %v1666_v41 = vrot.slane %v1658_v25, %v4910_v52  ;;  %v1682_v42 = vrot.slane %v1674_v29, %v4910_v52  ;;  %v1673_v43 = vrot.slane %v1659_v32, %v4910_v52  ;;  %v1689_v26 = vrot.slane %v1675_v33, %v4910_v52  ;;  %v2502_v25 = vld [vmem:[#allocation13 + $0x10] sm:$0xff]  ;;  %v2503_v29 = vld [vmem:[#allocation13 + $0x18] sm:$0xff] }
 0x509   : > { %v1622_v46 = vcombine.low %v1598_v34, %v1614_v35  ;;  %v1623_v47 = vcombine.high %v1598_v34, %v1614_v35  ;;  %v1624_v48 = vcombine.low %v1605_v39, %v1621_v40  ;;  %v1625_v49 = vcombine.high %v1605_v39, %v1621_v40 }
 0x50a   : > { %v1690_v50 = vcombine.low %v1666_v41, %v1682_v42  ;;  %v1691_v51 = vcombine.high %v1666_v41, %v1682_v42  ;;  %v1692_v53 = vcombine.low %v1673_v43, %v1689_v26  ;;  %v1693_v54 = vcombine.high %v1673_v43, %v1689_v26 }
 0x50b   : > { %v3376_v9 = vpack.c.bf16 %v2501_v8, %v2500_v7  ;;  %v3379_v39 = vpack.c.bf16 %v2503_v29, %v2502_v25  ;;  %v3147_v25 = vld [vmem:[#allocation16] ss:$0 sm:$0xff] }
 0x50c   : > { %v3364_v55 = vpack.c.bf16 %v1690_v50, %v1622_v46  ;;  %v3367_v56 = vpack.c.bf16 %v1691_v51, %v1623_v47  ;;  %v3370_v57 = vpack.c.bf16 %v1692_v53, %v1624_v48  ;;  %v3373_v58 = vpack.c.bf16 %v1693_v54, %v1625_v49 }
 0x50e   : > { %3365 = vmatpush3.bf16.msra.mxu0 %v3364_v55  ;;  %3368 = vmatpush3.bf16.msra.mxu1 %v3367_v56 }
 0x50f   : > { %3369 = vmatprep.subr.bf16.mxu0 %v4231_v0  ;;  %3372 = vmatprep.subr.bf16.mxu1 %v4231_v0 }
 0x57e   : > { %v2041_v59 = vpop.xlane.xlu1 %2040 }
 0x57f   : > { %3629 = vrcp.f32 %v2041_v59  ;;  %v2038_v60 = vpop.xlane.xlu0 %2037 }
 0x580   : > { %3631 = vrcp.f32 %v2038_v60 }
 0x586   : > { %v2047_v61 = vpop.xlane.xlu0 %2046 }
 0x587   : > { %3633 = vrcp.f32 %v2047_v61  ;;  %v2044_v62 = vpop.xlane.xlu1 %2043 }
 0x588   : > { %3635 = vrcp.f32 %v2044_v62 }
 0x589   : > { %v3630_v63 = vpop.eup %3629 }
 0x58a   : > { %v3632_v2 = vpop.eup %3631  ;;  %v2053_v3 = vmul.f32 %v3630_v63, %v5002_v30 }
 0x58b   : > { %v2052_v4 = vmul.f32 %v3632_v2, %v5004_v44 }
 0x58c   : > { %3276 = vmatmul.mubr.msk.f32.vlgmr.msra.gmra.mrb[8].mxu1 %vm2011_vm4, %v2053_v3 }
 0x58d   : > { %3269 = vmatmul.mubr.msk.f32.vlgmr.msra.gmra.mrb[4].mxu0 %vm2011_vm4, %v2052_v4  ;;  %3374 = vmatpush3.bf16.msra.mxu1 %v3373_v58 }
 0x58e   : > { %3371 = vmatpush3.bf16.msra.mxu0 %v3370_v57  ;;  %3282 = vmatprep.mubr.msk.f32.mxu0 %vm4232_vm0, %v4233_v1 }
 0x58f   : > { %3289 = vmatprep.mubr.msk.f32.mxu1 %vm4232_vm0, %v4233_v1  ;;  %3375 = vmatprep.subr.bf16.mxu0 %v4231_v0 }
 0x590   : > { %3381 = vmatprep.subr.bf16.mxu1 %v4231_v0 }
 0x591   : > { %v3634_v5 = vpop.eup %3633 }
 0x592   : > { %v2055_v30 = vmul.f32 %v3634_v5, %v5010_v27  ;;  %v3636_v44 = vpop.eup %3635 }
 0x593   : > { %v2054_v6 = vmul.f32 %v3636_v44, %v5012_v28 }
 0x594   : > { %3290 = vmatmul.mubr.msk.f32.vlgmr.msra.gmra.mrb[10].mxu1 %vm2011_vm4, %v2055_v30 }
 0x595   : > { %3311 = vmatprep.mubr.msk.f32.mxu1 %vm4232_vm0, %v4233_v1  ;;  %3283 = vmatmul.mubr.msk.f32.vlgmr.msra.gmra.mrb[6].mxu0 %vm2011_vm4, %v2054_v6 }
 0x596   : > { %3300 = vmatprep.mubr.msk.f32.mxu0 %vm4232_vm0, %v4233_v1  ;;  %3377 = vmatpush3.bf16.msra.mxu0 %v3376_v9 }
 0x597   : > { %3378 = vmatprep.subr.bf16.mxu0 %v4231_v0 }
 0x59a   : > { %3380 = vmatpush3.bf16.msra.mxu0 %v3379_v39  ;;  %v2707_v39 = vld [vmem:[#allocation22 + $0x38] sm:$0xff] }
 0x59b   : > { %3387 = vmatprep.subr.bf16.mxu0 %v4231_v0 }
 0x65f   : > { %v2198_v27 = vpop.f32.mrb[8].mxu1 }
 0x660   : > { %v2125_v10 = vpop.f32.mrb[4].mxu0  ;;  %v3277_v11 = vpop.f32.mrb[9].mxu1 }
 0x661   : > { %v3270_v28 = vpop.f32.mrb[5].mxu0 }
 0x662   : > { %v2615_v28 = vld [vmem:[#allocation19] sm:$0xff] }
 0x667   : > { %v2344_v21 = vpop.f32.mrb[10].mxu1 }
 0x668   : > { %v2364_v37 = vcombine.low %v2198_v27, %v2344_v21  ;;  %v2365_v23 = vcombine.high %v2198_v27, %v2344_v21  ;;  %v3291_v12 = vpop.f32.mrb[11].mxu1  ;;  %v2271_v36 = vpop.f32.mrb[6].mxu0  ;;  %v2616_v21 = vld [vmem:[#allocation19 + $0x8] sm:$0xff] }
 0x669   : > { %v2348_v14 = vcombine.low %v2125_v10, %v2271_v36  ;;  %v2349_v31 = vcombine.high %v2125_v10, %v2271_v36  ;;  %v3284_v16 = vpop.f32.mrb[7].mxu0  ;;  %v2701_v36 = vld [vmem:[#allocation22 + $0x8] sm:$0xff] }
 0x66a   : > { %v2372_v15 = vrot.slane %v2364_v37, %v4886_v38  ;;  %v2379_v45 = vrot.slane %v2365_v23, %v4886_v38  ;;  %v3382_v37 = vpack.c.bf16 %v2616_v21, %v2615_v28  ;;  %v2618_v23 = vld [vmem:[#allocation19 + $0x18] sm:$0xff]  ;;  %v2704_v16 = vld [vmem:[#allocation22 + $0x20] sm:$0xff] }
 0x66b   : > { %v2356_v17 = vrot.slane %v2348_v14, %v4886_v38  ;;  %v2363_v18 = vrot.slane %v2349_v31, %v4886_v38  ;;  %v2702_v14 = vld [vmem:[#allocation22 + $0x10] sm:$0xff] }
 0x66c   : > { %3383 = vmatpush3.bf16.msra.mxu1 %v3382_v37 }
 0x66d   : > { %v2380_v19 = vcombine.low %v2356_v17, %v2372_v15  ;;  %v2381_v20 = vcombine.high %v2356_v17, %v2372_v15  ;;  %v2396_v22 = vcombine.low %v2363_v18, %v2379_v45  ;;  %v2397_v24 = vcombine.high %v2363_v18, %v2379_v45  ;;  %3384 = vmatprep.subr.bf16.mxu1 %v4231_v0  ;;  %v2703_v15 = vld [vmem:[#allocation22 + $0x18] sm:$0xff]  ;;  %v2705_v17 = vld [vmem:[#allocation22 + $0x28] sm:$0xff] }
 0x66e   : > { %v3391_v45 = vpack.c.bf16 %v2703_v15, %v2702_v14  ;;  %v3394_v18 = vpack.c.bf16 %v2705_v17, %v2704_v16 }
 0x66f   : > { %v2388_v32 = vrot.slane %v2380_v19, %v4910_v52  ;;  %v2395_v33 = vrot.slane %v2381_v20, %v4910_v52  ;;  %v2404_v34 = vrot.slane %v2396_v22, %v4910_v52  ;;  %v2411_v35 = vrot.slane %v2397_v24, %v4910_v52 }
 0x671   : > { %v2416_v40 = vcombine.low %v2388_v32, %v2395_v33  ;;  %v3143_v41 = vcombine.high %v2388_v32, %v2395_v33  ;;  %v2432_v42 = vcombine.low %v2404_v34, %v2411_v35  ;;  %v3144_v43 = vcombine.high %v2404_v34, %v2411_v35  ;;  %v3148_v32 = vld [vmem:[#allocation17] ss:$0 sm:$0xff]  ;;  %v2706_v35 = vld [vmem:[#allocation22 + $0x30] sm:$0xff] }
 0x673   : > { %v2423_v26 = vrot.slane %v2416_v40, %v4886_v38  ;;  %v2431_v46 = vrot.slane %v3143_v41, %v4886_v38  ;;  %v2439_v47 = vrot.slane %v2432_v42, %v4886_v38  ;;  %v2447_v48 = vrot.slane %v3144_v43, %v4886_v38  ;;  %v3149_v41 = vld [vmem:[#allocation20] ss:$0 sm:$0xff] }
 0x674   : > { %v3397_v40 = vpack.c.bf16 %v2707_v39, %v2706_v35 }
 0x675   : > { %v2449_v49 = vcombine.high %v2423_v26, %v2431_v46  ;;  %v2465_v50 = vcombine.high %v2439_v47, %v2447_v48  ;;  %v2448_v51 = vcombine.low %v2423_v26, %v2431_v46  ;;  %v2464_v53 = vcombine.low %v2439_v47, %v2447_v48  ;;  %v3151_v46 = vld [vmem:[#allocation23] ss:$0 sm:$0xff] }
 0x677   : > { %v2463_v54 = vrot.slane %v2449_v49, %v4910_v52  ;;  %v2479_v55 = vrot.slane %v2465_v50, %v4910_v52  ;;  %v2456_v56 = vrot.slane %v2448_v51, %v4910_v52  ;;  %v2472_v57 = vrot.slane %v2464_v53, %v4910_v52  ;;  %v3145_v52 = vld [vmem:[#allocation14] ss:$0 sm:$0xff] }
 0x679   : > { %v2482_v58 = vcombine.low %v2463_v54, %v2479_v55  ;;  %v2481_v59 = vcombine.high %v2456_v56, %v2472_v57  ;;  %v2483_v60 = vcombine.high %v2463_v54, %v2479_v55  ;;  %v2480_v61 = vcombine.low %v2456_v56, %v2472_v57 }
 0x67b   : > { %2489 = vrot.lane.b32.xlu1 %v2482_v58, %s4240_s16  ;;  %2485 = vrot.lane.b32.xlu0 %v2481_v59, %s4241_s24 }
 0x67f   : > { %2493 = vrot.lane.b32.xlu1 %v2483_v60, %s4242_s8 }
 0x6ed   : > { %v2490_v38 = vpop.permute.xlu1 %2489  ;;  %v2486_v62 = vpop.permute.xlu0 %2485 }
 0x6ee   : > { %v2496_v63 = vsel %vm1694_vm2, %v2480_v61, %v2486_v62 }
 0x6ef   : > { %v2497_v3 = vsel %vm2011_vm4, %v2496_v63, %v2490_v38  ;;  %v3153_v38 = vld [vmem:[#allocation25] ss:$0 sm:$0xff]  ;;  %v3154_v63 = vld [vmem:[#allocation26] ss:$0 sm:$0xff] }
 0x6f1   : > { %v2494_v2 = vpop.permute.xlu1 %2493 }
 0x6f2   : > { %v2499_v4 = vsel %vm2498_vm5, %v2497_v3, %v2494_v2 }
 0x6f3   : > { %3301 = vmatmul.mubr.msk.f32.vlgmr.msra.gmra.mrb[8].mxu0 %vm793_vm1, %v2499_v4 }
 0x6f4   : > { %3330 = vmatprep.mubr.msk.f32.mxu0 %vm4232_vm0, %v4233_v1  ;;  %v2617_v1 = vld [vmem:[#allocation19 + $0x10] sm:$0xff] }
 0x6f5   : > { %v3385_v12 = vpack.c.bf16 %v2618_v23, %v2617_v1 }
 0x6f7   : > { %3386 = vmatpush3.bf16.msra.mxu1 %v3385_v12 }
 0x7c6   : > { %v2580_v5 = vpop.f32.mrb[8].mxu0 }
 0x7c7   : > { %v2581_v30 = vadd.f32 %v3145_v52, %v2580_v5  ;;  %v3302_v44 = vpop.f32.mrb[9].mxu0 }
 0x7c9   : > { %v2584_v6 = vadd.f32 %v2581_v30, %v4852_v13  ;;  %v2700_v13 = vld [vmem:[#allocation22] sm:$0xff] }
 0x7ca   : > { %v3388_v31 = vpack.c.bf16 %v2701_v36, %v2700_v13 }
 0x7cb   : > { %v2585_v7 = vsel %vm793_vm1, %v2584_v6, 0.0 }
 0x7cc   : > { %2586 = vadd.xlane.f32.xlu0 %v2585_v7  ;;  %3389 = vmatpush3.bf16.msra.mxu0 %v3388_v31 }
 0x7cd   : > { %3390 = vmatprep.subr.bf16.mxu0 %v4231_v0 }
 0x7d0   : > { %3392 = vmatpush3.bf16.msra.mxu0 %v3391_v45 }
 0x7d1   : > { %3393 = vmatprep.subr.bf16.mxu0 %v4231_v0 }
 0x7d4   : > { %3395 = vmatpush3.bf16.msra.mxu0 %v3394_v18 }
 0x7d5   : > { %3396 = vmatprep.subr.bf16.mxu0 %v4231_v0 }
 0x7d8   : > { %3398 = vmatpush3.bf16.msra.mxu0 %v3397_v40 }
 0x859   : > { %v2587_v8 = vpop.xlane.xlu0 %2586 }
 0x85a   : > { %v2589_v9 = vmul.f32 0.03125, %v2587_v8 }
 0x85c   : > { %v2590_v27 = vsub.f32 %v2584_v6, %v2589_v9 }
 0x85e   : > { %v2591_v10 = vmul.f32 %v2590_v27, %v2590_v27 }
 0x860   : > { %v2592_v11 = vsel %vm793_vm1, %v2591_v10, 0.0 }
 0x861   : > { %2593 = vadd.xlane.f32.xlu1 %v2592_v11 }
 0x8ee   : > { %v2594_v19 = vpop.xlane.xlu1 %2593 }
 0x8ef   : > { %v2595_v20 = vmul.f32 0.03125, %v2594_v19 }
 0x8f1   : > { %v2596_v22 = vadd.f32 1e-05, %v2595_v20 }
 0x8f3   : > { %3637 = vrsqrt.f32 %v2596_v22 }
 0x8fd   : > { %v3638_v24 = vpop.eup %3637 }
 0x8fe   : > { %v2598_v29 = vmul.f32 %v3638_v24, %v2590_v27 }
 0x900   : > { %v2606_v33 = vmul.f32 %v3147_v25, %v2598_v29 }
 0x902   : > { %v2614_v34 = vadd.f32 %v3148_v32, %v2606_v33 }
 0x904   : > { %3312 = vmatmul.mubr.msk.f32.vlgmr.msra.gmra.mrb[12].mxu1 %vm793_vm1, %v2614_v34 }
 0x9d7   : > { %v2695_v42 = vpop.f32.mrb[12].mxu1 }
 0x9d8   : > { %v2696_v43 = vadd.f32 %v3149_v41, %v2695_v42  ;;  %v3313_v0 = vpop.f32.mrb[13].mxu1 }
 0x9da   : > { %v2699_v26 = vmax.f32 %v2696_v43, 0.0 }
 0x9dc   : > { %3331 = vmatmul.mubr.msk.f32.vlgmr.msra.gmra.mrb[10].mxu0 %vm2715_vm6, %v2699_v26 }
 0xaaf   : > { %v2785_v47 = vpop.f32.mrb[10].mxu0 }
 0xab0   : > { %v2786_v48 = vadd.f32 %v3151_v46, %v2785_v47  ;;  %v3332_v49 = vpop.f32.mrb[11].mxu0 }
 0xab2   : > { %v2789_v50 = vadd.f32 %v2786_v48, %v2614_v34 }
 0xab4   : > { %v2790_v51 = vsel %vm793_vm1, %v2789_v50, 0.0 }
 0xab5   : > { %2791 = vadd.xlane.f32.xlu0 %v2790_v51 }
 0xb42   : > { %v2792_v53 = vpop.xlane.xlu0 %2791 }
 0xb43   : > { %v2793_v54 = vmul.f32 0.03125, %v2792_v53 }
 0xb45   : > { %v2794_v55 = vsub.f32 %v2789_v50, %v2793_v54 }
 0xb47   : > { %v2795_v56 = vmul.f32 %v2794_v55, %v2794_v55 }
 0xb49   : > { %v2796_v57 = vsel %vm793_vm1, %v2795_v56, 0.0 }
 0xb4a   : > { %2797 = vadd.xlane.f32.xlu0 %v2796_v57 }
 0xbd7   : > { %v2798_v58 = vpop.xlane.xlu0 %2797 }
 0xbd8   : > { %v2799_v59 = vmul.f32 0.03125, %v2798_v58 }
 0xbda   : > { %v2800_v60 = vadd.f32 1e-05, %v2799_v59 }
 0xbdc   : > { %3639 = vrsqrt.f32 %v2800_v60 }
 0xbe6   : > { %v3640_v61 = vpop.eup %3639 }
 0xbe7   : > { %v2802_v62 = vmul.f32 %v3640_v61, %v2794_v55 }
 0xbe9   : > { %v2810_v2 = vmul.f32 %v3153_v38, %v2802_v62 }
 0xbeb   : > { %v2818_v3 = vadd.f32 %v3154_v63, %v2810_v2 }
 0xbed   : > { %2819 = vst.msk [vmem:[%s778_s6] sm:$0xff] %vm793_vm1, %v2818_v3 }
 0xbee   : > { %4106 = shalt.err (!%p4103_p9)
}
 0xbef   : > { %s4107_s4 = scalar_lea.hbm %s5109_s2, 128  ;;  %s4111_s24 = scalar_lea.hbm %s5259_s29, 256 }
 0xbf0   : > { %p4108_p0 = scmp.ne.s32.totalorder %s5109_s2, %s4107_s4  ;;  %p4112_p1 = scmp.lt.u32.totalorder %s5109_s2, %s5259_s29 }
 0xbf1   : > { %p4113_p10 = scmp.lt.u32.totalorder %s4111_s24, %s4107_s4  ;;  %p4115_p8 = scmp.lt.u32.totalorder %s4107_s4, %s5109_s2 }
 0xbf2   : > { %p4109_p7 = pnand %p4108_p0, %p5260_p3 }
 0xbf3   : > { %p4114_p12 = por %p4113_p10, %p4112_p1 }
 0xbf4   : > { %p4110_p5 = pneg %p4109_p7 }
 0xbf5   : > { %p4116_p11 = por %p4115_p8, %p4114_p12 }
 0xbf7   : > { %p4117_p6 = pnand %p4116_p11, %p4110_p5 }
 0xbf9   : > { %4120 = shalt.err (!%p4117_p6)
}
 0xbfa   : > { %3459 = dma.vmem_to_hbm [thread:$0]  (%p5260_p3), %s5111_s17, 128, %s5109_s2, %s2821_s21  }
 0xbfb PF: > { %s5261_s18 = sld [smem:[#allocation40_spill]]  ;;  %p5262_p2 = scmp.ne.s32.totalorder %s5230_s28, 0 }
 0xbfc   : > { %p5263_p13 = scmp.ge.s32.totalorder %s4211_s26, 2 }
 0xbfe   : > { %p3512_p4 = pnand %p5263_p13, %p5262_p2 }
 0xc01   : > { %s2847_s6 = sand.u32 1, %s5261_s18  }
 0xc02   : > { %s2848_s3 = scalar_lea.sflag [#allocation4], %s2847_s6 }
 0xc03   : > { %4186 = dma.done.wait (!%p3512_p4), %s2848_s3, 128  }
 0xc04   : > { %4188 = vsyncadd (!%p3512_p4), %s2848_s3, 4294967168  ;;  %s42_s26 = sadd.s32 1, %s4211_s26   ;;  %s5264_s21 = sld [smem:[#allocation41_spill]] }
 0xc05   : > { %p39_p9 = scmp.ge.s32.totalorder %s42_s26, 4   ;;  %s5265_s22 = sld [smem:[#allocation42_spill]] }
 0xc06   : > { %s5266_s24 = sld [smem:[#allocation44_spill]]  ;;  %s5267_s23 = smov %s4697_s20 }
 0xc07   : > { %s5268_s25 = smov %s5270_s30  ;;  %41 = sbr.rel (!%p39_p9) target bundleno = 26 (0x1a), region = 198 }
 0xc0e   :  { %2853 = vsyncpa [#allocation3], 1 }
 0xc0f   :  { %2855 = vsyncpa [#allocation3 + $0x1], 1 }
 0xc10   :  { %2856 = vsyncpa [#allocation6], 1 }
 0xc11   :  { %2858 = vsyncpa [#allocation6 + $0x1], 1 }
 0xc12   :  { %2859 = vsyncpa [#allocation9], 1 }
 0xc13   :  { %2860 = vsyncpa [#allocation12], 1 }
 0xc14   :  { %2861 = vsyncpa [#allocation15], 1 }
 0xc15   :  { %2862 = vsyncpa [#allocation18], 1 }
 0xc16   :  { %2863 = vsyncpa [#allocation21], 1 }
 0xc17   :  { %2864 = vsyncpa [#allocation24], 1 }
 0xc18   :  { %2865 = vsyncpa [#allocation27], 1 }
 0xc19   :  { %2866 = vsyncpa [#allocation4], 1 }
 0xc1a   :  { %2868 = vsyncpa [#allocation4 + $0x1], 1 }

</bundles_post_ra>
